<compile_context>
chip_gen: v5e
topology: v5e:2x2
jax: 0.10.0
libtpu: 0.0.40
codegen_flags: <defaults>
</compile_context>

<pallas_src>
import functools

import jax
import jax.numpy as jnp
from jax import lax
from jax.experimental import pallas as pl
from jax.experimental.pallas import tpu as pltpu

_BIG = 1e30


def _round_up(x, m):
    return (x + m - 1) // m * m


def _triplet_hard_kernel(xq_ref, xk_ref, sqc_ref, sqr_ref, labc_ref, labr_ref,
                         out_ref, ap_acc, an_acc, *,
                         margin, hard_factor, n, tm, tk):
    k = pl.program_id(1)
    nk = pl.num_programs(1)
    # Hoisted out of the finalize pl.when: program_id must not be bound inside a
    # cond body (no lowering for it when the cond sub-jaxpr is re-traced).
    row_base = pl.program_id(0) * tm
    big = jnp.float32(_BIG)

    @pl.when(k == 0)
    def _init():
        # Running max/min of (||key||^2 - 2<a,key>) per anchor, per lane column.
        ap_acc[...] = jnp.full_like(ap_acc, -big)
        an_acc[...] = jnp.full_like(an_acc, big)

    # (TM, TK) cross-term tile on the MXU (bf16 in, f32 accumulate); the key
    # transpose is folded into the operand feed (contract dim 1 of both).
    cross = lax.dot_general(xq_ref[...], xk_ref[...],
                            dimension_numbers=(((1,), (1,)), ((), ())),
                            preferred_element_type=jnp.float32)
    # Anchor norm is constant per row -> deferred to finalize.
    part = sqr_ref[...] - 2.0 * cross                     # (TM, TK)

    # Padded keys carry sentinel labels (never positive) and +1e30 norms (never
    # the hardest negative), so a single compare + two selects suffice.
    is_pos = labc_ref[...] == labr_ref[...]               # (TM, TK)
    pos_v = jnp.where(is_pos, part, -big)
    neg_v = jnp.where(is_pos, big, part)

    # Lane-wise (pure VPU) fold of the TK/128 vreg columns; the XLU cross-lane
    # reduce is done once at finalize instead of every key step.
    pm = pos_v[:, 0:128]
    nm = neg_v[:, 0:128]
    for c in range(1, tk // 128):
        sl = slice(c * 128, (c + 1) * 128)
        pm = jnp.maximum(pm, pos_v[:, sl])
        nm = jnp.minimum(nm, neg_v[:, sl])
    ap_acc[...] = jnp.maximum(ap_acc[...], pm)
    an_acc[...] = jnp.minimum(an_acc[...], nm)

    @pl.when(k == nk - 1)
    def _finalize():
        sqc = sqc_ref[...]                                            # (TM, 1)
        ap = jnp.max(ap_acc[...], axis=1, keepdims=True) + sqc        # hardest pos d^2
        an = jnp.min(an_acc[...], axis=1, keepdims=True) + sqc        # hardest neg d^2
        # sqrt/clip only on the 2*TM mined values (matches clamp(1e-12).sqrt()).
        d_ap = jnp.sqrt(jnp.maximum(ap, 1e-12)) * jnp.float32(1.0 + hard_factor)
        d_an = jnp.sqrt(jnp.maximum(an, 1e-12)) * jnp.float32(1.0 - hard_factor)
        if margin is not None:
            # MarginRankingLoss(margin), y=1: max(0, dist_ap - dist_an + margin)
            per = jnp.maximum(d_ap - d_an + jnp.float32(margin), 0.0)
        else:
            # SoftMarginLoss, y=1: log(1 + exp(-(dist_an - dist_ap))), stable form
            diff = d_an - d_ap
            per = jnp.maximum(-diff, 0.0) + jnp.log1p(jnp.exp(-jnp.abs(diff)))
        row = row_base + lax.broadcasted_iota(jnp.int32, (tm, 1), 0)
        per = jnp.where(row < n, per, 0.0)                 # mask padded anchors
        out_ref[...] = jnp.full(out_ref.shape, jnp.sum(per), dtype=jnp.float32)


def triplet_hard_loss(features, labels, margin=None, hard_factor=0.0,
                      normalize_feature=False, compute_dtype=jnp.bfloat16):
    """JAX/Pallas equivalent of TripletHardLoss.forward(inputs, targets)."""
    features = jnp.asarray(features, jnp.float32)
    labels = jnp.asarray(labels, jnp.int32).reshape(-1)
    if normalize_feature:
        norm = jnp.sqrt(jnp.sum(features * features, axis=-1, keepdims=True))
        features = features / (norm + 1e-12)

    n, d = features.shape
    dp = _round_up(d, 128)
    np_ = _round_up(n, 256)         # full-width tiles on the 2x256x256 MXU (v6e/v7x)

    # Row tile: big to cut key-stream re-reads, but always >=2 row blocks so both
    # v7x TensorCores get work on the "parallel" axis.
    if np_ >= 1024:
        tm = 512
    elif np_ >= 512:
        tm = 256
    else:                            # np_ == 256 -> two row blocks
        tm = 128
    # Key tile: grid-resident (DMA'd exactly once) when it fits a small budget.
    isz = jnp.dtype(compute_dtype).itemsize
    if np_ * dp * isz <= 8 * 1024 * 1024:
        tk = np_
    elif np_ % 512 == 0:
        tk = 512
    else:
        tk = 256
    num_i = np_ // tm
    num_k = np_ // tk

    # Pad features (zeros) and store in the compute dtype (bf16 halves HBM bytes).
    x = jnp.zeros((np_, dp), compute_dtype).at[:n, :d].set(
        features.astype(compute_dtype))
    # Padded keys: out-of-range label sentinel + poisoned squared norm.
    lab = jnp.full((np_,), jnp.iinfo(jnp.int32).min, jnp.int32).at[:n].set(labels)
    sq = jnp.sum(x.astype(jnp.float32) ** 2, axis=1)
    sq = jnp.where(jnp.arange(np_) < n, sq, jnp.float32(_BIG))

    sq_col = sq.reshape(np_, 1)
    sq_row = sq.reshape(1, np_)      # lane-dense, no in-kernel transposes
    lab_col = lab.reshape(np_, 1)
    lab_row = lab.reshape(1, np_)

    kernel = functools.partial(_triplet_hard_kernel, margin=margin,
                               hard_factor=float(hard_factor), n=n, tm=tm, tk=tk)

    # Explicit scoped-VMEM budget (v5e's default is only 16 MiB); capped well
    # under v7x's 64 MiB physical VMEM.
    needed = 2 * (tm * dp + tk * dp) * isz + 2 * tm * 128 * 4 + (1 << 20)
    vmem_limit = int(min(max(needed * 3 // 2, 16 * 1024 * 1024), 48 * 1024 * 1024))

    block_sums = pl.pallas_call(
        kernel,
        out_shape=jax.ShapeDtypeStruct((num_i, 8, 128), jnp.float32),
        grid_spec=pltpu.PrefetchScalarGridSpec(
            num_scalar_prefetch=0,
            grid=(num_i, num_k),
            in_specs=[
                pl.BlockSpec((tm, dp), lambda i, k: (i, 0)),   # anchor rows
                pl.BlockSpec((tk, dp), lambda i, k: (k, 0)),   # key rows
                pl.BlockSpec((tm, 1), lambda i, k: (i, 0)),    # ||a||^2 column
                pl.BlockSpec((1, tk), lambda i, k: (0, k)),    # ||k||^2 row
                pl.BlockSpec((tm, 1), lambda i, k: (i, 0)),    # labels column
                pl.BlockSpec((1, tk), lambda i, k: (0, k)),    # labels row
            ],
            out_specs=pl.BlockSpec((1, 8, 128), lambda i, k: (i, 0, 0)),
            scratch_shapes=[pltpu.VMEM((tm, 128), jnp.float32),  # hardest-pos acc
                            pltpu.VMEM((tm, 128), jnp.float32)],  # hardest-neg acc
        ),
        compiler_params=pltpu.CompilerParams(
            dimension_semantics=("parallel", "arbitrary"),
            vmem_limit_bytes=vmem_limit),
    )(x, x, sq_col, sq_row, lab_col, lab_row)

    return jnp.sum(block_sums[:, 0, 0]) / jnp.float32(n)


def _ref_loss(features, labels, margin=None, hard_factor=0.0):
    """Pure-JAX reference mirroring the PyTorch module (full-precision matmul)."""
    x = features.astype(jnp.float32)
    sq = jnp.sum(x * x, axis=1, keepdims=True)
    gram = jnp.dot(x, x.T, precision=lax.Precision.HIGHEST)
    dist = jnp.sqrt(jnp.clip(sq + sq.T - 2.0 * gram, 1e-12, None))
    is_pos = labels[:, None] == labels[None, :]
    dist_ap = jnp.max(jnp.where(is_pos, dist, -jnp.inf), axis=1) * (1.0 + hard_factor)
    dist_an = jnp.min(jnp.where(is_pos, jnp.inf, dist), axis=1) * (1.0 - hard_factor)
    if margin is not None:
        return jnp.mean(jnp.maximum(dist_ap - dist_an + margin, 0.0))
    return jnp.mean(jnp.log1p(jnp.exp(-(dist_an - dist_ap))))


if __name__ == "__main__":
    key = jax.random.PRNGKey(0)
    N, D = 8, 32                      # batch=8, feat_dim=32; 4 classes x 2 samples
    feats = jax.random.normal(key, (N, D), dtype=jnp.float32)
    labels = jnp.array([0, 0, 1, 1, 2, 2, 3, 3], dtype=jnp.int32)

    # --- f32 compute path: validates mining / loss logic against the reference.
    loss_soft_f32 = jax.block_until_ready(
        triplet_hard_loss(feats, labels, compute_dtype=jnp.float32))
    ref_soft = _ref_loss(feats, labels)
    assert jnp.allclose(loss_soft_f32, ref_soft, atol=2e-3, rtol=2e-3), \
        (loss_soft_f32, ref_soft)

    loss_margin_f32 = jax.block_until_ready(
        triplet_hard_loss(feats, labels, margin=0.3, hard_factor=0.1,
                          normalize_feature=True, compute_dtype=jnp.float32))
    feats_n = feats / (jnp.sqrt(jnp.sum(feats * feats, axis=-1, keepdims=True)) + 1e-12)
    ref_margin = _ref_loss(feats_n, labels, margin=0.3, hard_factor=0.1)
    assert jnp.allclose(loss_margin_f32, ref_margin, atol=2e-3, rtol=2e-3), \
        (loss_margin_f32, ref_margin)

    # --- default bf16 fast path (~3x MXU, half the key HBM bytes): looser
    # tolerance reflects bf16 rounding of the cross term.
    loss_soft_bf16 = jax.block_until_ready(triplet_hard_loss(feats, labels))
    assert jnp.allclose(loss_soft_bf16, ref_soft, atol=7e-2, rtol=7e-2), \
        (loss_soft_bf16, ref_soft)

    print("KERNEL_OK")
</pallas_src>

<mosaic_0001>
module attributes {stable_mosaic.version = 11 : i64} {
  func.func @_triplet_hard_kernel(%arg0: i32, %arg1: i32, %arg2: memref<128x128xf32, #tpu.memory_space<vmem>>, %arg3: memref<256x128xf32, #tpu.memory_space<vmem>>, %arg4: memref<128x1xf32, #tpu.memory_space<vmem>>, %arg5: memref<1x256xf32, #tpu.memory_space<vmem>>, %arg6: memref<128x1xi32, #tpu.memory_space<vmem>>, %arg7: memref<1x256xi32, #tpu.memory_space<vmem>>, %arg8: memref<1x8x128xf32, #tpu.memory_space<vmem>>, %arg9: memref<128x128xf32, #tpu.memory_space<vmem>>, %arg10: memref<128x128xf32, #tpu.memory_space<vmem>>) attributes {dimension_semantics = [#tpu.dimension_semantics<parallel>, #tpu.dimension_semantics<arbitrary>], iteration_bounds = array<i64: 2, 1>, scalar_prefetch = 0 : i64, scratch_operands = 2 : i64, tpu.core_type = #tpu.core_type<tc>, window_params = [{transform_indices = @transform_0, window_bounds = array<i64: 128, 128>}, {transform_indices = @transform_1, window_bounds = array<i64: 256, 128>}, {transform_indices = @transform_2, window_bounds = array<i64: 128, 1>}, {transform_indices = @transform_3, window_bounds = array<i64: 1, 256>}, {transform_indices = @transform_4, window_bounds = array<i64: 128, 1>}, {transform_indices = @transform_5, window_bounds = array<i64: 1, 256>}, {transform_indices = @transform_6, window_bounds = array<i64: 1, 8, 128>}]} {
    %c128_i32 = arith.constant 128 : i32
    %0 = arith.muli %arg0, %c128_i32 : i32
    %c0_i32 = arith.constant 0 : i32
    %1 = arith.cmpi eq, %arg1, %c0_i32 : i32
    %2 = arith.extui %1 : i1 to i32
    %cst = arith.constant 1.000000e+30 : f32
    %c0_i32_0 = arith.constant 0 : i32
    %3 = arith.cmpi ne, %2, %c0_i32_0 : i32
    scf.if %3 {
      %cst_25 = arith.constant 0.000000e+00 : f32
      %37 = arith.subf %cst_25, %cst : f32
      %38 = vector.broadcast %37 : f32 to vector<128x128xf32>
      %c0_26 = arith.constant 0 : index
      %c0_27 = arith.constant 0 : index
      %39 = vector.load %arg9[%c0_26, %c0_27] : memref<128x128xf32, #tpu.memory_space<vmem>>, vector<128x128xf32>
      tpu.vector_store %arg9[%c0_26, %c0_27], %38 {strides = array<i32>} : memref<128x128xf32, #tpu.memory_space<vmem>>, vector<128x128xf32>,
      %40 = vector.broadcast %cst : f32 to vector<128x128xf32>
      %c0_28 = arith.constant 0 : index
      %c0_29 = arith.constant 0 : index
      %41 = vector.load %arg10[%c0_28, %c0_29] : memref<128x128xf32, #tpu.memory_space<vmem>>, vector<128x128xf32>
      tpu.vector_store %arg10[%c0_28, %c0_29], %40 {strides = array<i32>} : memref<128x128xf32, #tpu.memory_space<vmem>>, vector<128x128xf32>,
    } else {
    }
    %c0 = arith.constant 0 : index
    %c0_1 = arith.constant 0 : index
    %4 = vector.load %arg2[%c0, %c0_1] : memref<128x128xf32, #tpu.memory_space<vmem>>, vector<128x128xf32>
    %c0_2 = arith.constant 0 : index
    %c0_3 = arith.constant 0 : index
    %5 = vector.load %arg3[%c0_2, %c0_3] : memref<256x128xf32, #tpu.memory_space<vmem>>, vector<256x128xf32>
    %cst_4 = arith.constant dense<0.000000e+00> : vector<128x256xf32>
    %6 = tpu.matmul %4, %5, %cst_4 {dimension_numbers = #tpu.dot_dimension_numbers<[1], [1], [0], [0], [0, 0, 1, 0], [], []>} : vector<128x128xf32>, vector<256x128xf32>, vector<128x256xf32> -> vector<128x256xf32>
    %c0_5 = arith.constant 0 : index
    %c0_6 = arith.constant 0 : index
    %7 = vector.load %arg5[%c0_5, %c0_6] : memref<1x256xf32, #tpu.memory_space<vmem>>, vector<1x256xf32>
    %cst_7 = arith.constant 2.000000e+00 : f32
    %8 = vector.broadcast %cst_7 : f32 to vector<128x256xf32>
    %9 = arith.mulf %8, %6 : vector<128x256xf32>
    %10 = vector.broadcast %7 : vector<1x256xf32> to vector<128x256xf32>
    %11 = arith.subf %10, %9 : vector<128x256xf32>
    %c0_8 = arith.constant 0 : index
    %c0_9 = arith.constant 0 : index
    %12 = vector.load %arg6[%c0_8, %c0_9] : memref<128x1xi32, #tpu.memory_space<vmem>>, vector<128x1xi32>
    %c0_10 = arith.constant 0 : index
    %c0_11 = arith.constant 0 : index
    %13 = vector.load %arg7[%c0_10, %c0_11] : memref<1x256xi32, #tpu.memory_space<vmem>>, vector<1x256xi32>
    %14 = vector.broadcast %12 : vector<128x1xi32> to vector<128x256xi32>
    %15 = vector.broadcast %13 : vector<1x256xi32> to vector<128x256xi32>
    %16 = arith.cmpi eq, %14, %15 : vector<128x256xi32>
    %cst_12 = arith.constant 0.000000e+00 : f32
    %cst_13 = arith.constant 1.000000e+30 : f32
    %17 = arith.subf %cst_12, %cst_13 : f32
    %18 = vector.broadcast %17 : f32 to vector<128x256xf32>
    %19 = arith.select %16, %11, %18 : vector<128x256xi1>, vector<128x256xf32>
    %cst_14 = arith.constant 1.000000e+30 : f32
    %20 = vector.broadcast %cst_14 : f32 to vector<128x256xf32>
    %21 = arith.select %16, %20, %11 : vector<128x256xi1>, vector<128x256xf32>
    %22 = vector.extract_strided_slice %19 {offsets = [0, 0], sizes = [128, 128], strides = [1, 1]} : vector<128x256xf32> to vector<128x128xf32>
    %23 = vector.extract_strided_slice %21 {offsets = [0, 0], sizes = [128, 128], strides = [1, 1]} : vector<128x256xf32> to vector<128x128xf32>
    %24 = vector.extract_strided_slice %19 {offsets = [0, 128], sizes = [128, 128], strides = [1, 1]} : vector<128x256xf32> to vector<128x128xf32>
    %25 = arith.maximumf %22, %24 : vector<128x128xf32>
    %26 = vector.extract_strided_slice %21 {offsets = [0, 128], sizes = [128, 128], strides = [1, 1]} : vector<128x256xf32> to vector<128x128xf32>
    %27 = arith.minimumf %23, %26 : vector<128x128xf32>
    %c0_15 = arith.constant 0 : index
    %c0_16 = arith.constant 0 : index
    %28 = vector.load %arg9[%c0_15, %c0_16] : memref<128x128xf32, #tpu.memory_space<vmem>>, vector<128x128xf32>
    %29 = arith.maximumf %28, %25 : vector<128x128xf32>
    %c0_17 = arith.constant 0 : index
    %c0_18 = arith.constant 0 : index
    %30 = vector.load %arg9[%c0_17, %c0_18] : memref<128x128xf32, #tpu.memory_space<vmem>>, vector<128x128xf32>
    tpu.vector_store %arg9[%c0_17, %c0_18], %29 {strides = array<i32>} : memref<128x128xf32, #tpu.memory_space<vmem>>, vector<128x128xf32>,
    %c0_19 = arith.constant 0 : index
    %c0_20 = arith.constant 0 : index
    %31 = vector.load %arg10[%c0_19, %c0_20] : memref<128x128xf32, #tpu.memory_space<vmem>>, vector<128x128xf32>
    %32 = arith.minimumf %31, %27 : vector<128x128xf32>
    %c0_21 = arith.constant 0 : index
    %c0_22 = arith.constant 0 : index
    %33 = vector.load %arg10[%c0_21, %c0_22] : memref<128x128xf32, #tpu.memory_space<vmem>>, vector<128x128xf32>
    tpu.vector_store %arg10[%c0_21, %c0_22], %32 {strides = array<i32>} : memref<128x128xf32, #tpu.memory_space<vmem>>, vector<128x128xf32>,
    %c0_i32_23 = arith.constant 0 : i32
    %34 = arith.cmpi eq, %arg1, %c0_i32_23 : i32
    %35 = arith.extui %34 : i1 to i32
    %c0_i32_24 = arith.constant 0 : i32
    %36 = arith.cmpi ne, %35, %c0_i32_24 : i32
    scf.if %36 {
      %c0_25 = arith.constant 0 : index
      %c0_26 = arith.constant 0 : index
      %37 = vector.load %arg4[%c0_25, %c0_26] : memref<128x1xf32, #tpu.memory_space<vmem>>, vector<128x1xf32>
      %c0_27 = arith.constant 0 : index
      %c0_28 = arith.constant 0 : index
      %38 = vector.load %arg9[%c0_27, %c0_28] : memref<128x128xf32, #tpu.memory_space<vmem>>, vector<128x128xf32>
      %cst_29 = arith.constant dense<0xFF800000> : vector<128xf32>
      %39 = vector.multi_reduction <maximumf>, %38, %cst_29 [1] : vector<128x128xf32> to vector<128xf32>
      %40 = vector.shape_cast %39 : vector<128xf32> to vector<128x1xf32>
      %41 = arith.addf %40, %37 : vector<128x1xf32>
      %c0_30 = arith.constant 0 : index
      %c0_31 = arith.constant 0 : index
      %42 = vector.load %arg10[%c0_30, %c0_31] : memref<128x128xf32, #tpu.memory_space<vmem>>, vector<128x128xf32>
      %cst_32 = arith.constant dense<0x7F800000> : vector<128xf32>
      %43 = vector.multi_reduction <minimumf>, %42, %cst_32 [1] : vector<128x128xf32> to vector<128xf32>
      %44 = vector.shape_cast %43 : vector<128xf32> to vector<128x1xf32>
      %45 = arith.addf %44, %37 : vector<128x1xf32>
      %cst_33 = arith.constant 9.99999996E-13 : f32
      %46 = vector.broadcast %cst_33 : f32 to vector<128x1xf32>
      %47 = arith.maximumf %41, %46 : vector<128x1xf32>
      %48 = math.sqrt %47 : vector<128x1xf32>
      %cst_34 = arith.constant 1.000000e+00 : f32
      %49 = vector.broadcast %cst_34 : f32 to vector<128x1xf32>
      %50 = arith.mulf %48, %49 : vector<128x1xf32>
      %cst_35 = arith.constant 9.99999996E-13 : f32
      %51 = vector.broadcast %cst_35 : f32 to vector<128x1xf32>
      %52 = arith.maximumf %45, %51 : vector<128x1xf32>
      %53 = math.sqrt %52 : vector<128x1xf32>
      %cst_36 = arith.constant 1.000000e+00 : f32
      %54 = vector.broadcast %cst_36 : f32 to vector<128x1xf32>
      %55 = arith.mulf %53, %54 : vector<128x1xf32>
      %56 = arith.subf %55, %50 : vector<128x1xf32>
      %cst_37 = arith.constant 0.000000e+00 : f32
      %57 = vector.broadcast %cst_37 : f32 to vector<128x1xf32>
      %58 = arith.subf %57, %56 : vector<128x1xf32>
      %cst_38 = arith.constant 0.000000e+00 : f32
      %59 = vector.broadcast %cst_38 : f32 to vector<128x1xf32>
      %60 = arith.maximumf %58, %59 : vector<128x1xf32>
      %61 = math.absf %56 : vector<128x1xf32>
      %cst_39 = arith.constant 0.000000e+00 : f32
      %62 = vector.broadcast %cst_39 : f32 to vector<128x1xf32>
      %63 = arith.subf %62, %61 : vector<128x1xf32>
      %64 = math.exp %63 : vector<128x1xf32>
      %65 = math.log1p %64 : vector<128x1xf32>
      %66 = arith.addf %60, %65 : vector<128x1xf32>
      %67 = tpu.iota {dimensions = array<i32: 0>} : vector<128x1xi32>
      %68 = vector.broadcast %0 : i32 to vector<128x1xi32>
      %69 = arith.addi %68, %67 : vector<128x1xi32>
      %c8_i32 = arith.constant 8 : i32
      %70 = vector.broadcast %c8_i32 : i32 to vector<128x1xi32>
      %71 = arith.cmpi slt, %69, %70 : vector<128x1xi32>
      %cst_40 = arith.constant 0.000000e+00 : f32
      %72 = vector.broadcast %cst_40 : f32 to vector<128x1xf32>
      %73 = arith.select %71, %66, %72 : vector<128x1xi1>, vector<128x1xf32>
      %74 = vector.shape_cast %73 : vector<128x1xf32> to vector<1x128x1xf32>
      %cst_41 = arith.constant dense<0.000000e+00> : vector<1xf32>
      %75 = vector.multi_reduction <add>, %74, %cst_41 [1, 2] : vector<1x128x1xf32> to vector<1xf32>
      %76 = vector.shape_cast %75 : vector<1xf32> to vector<1x1x1xf32>
      %77 = vector.extract %76[0, 0, 0] : f32 from vector<1x1x1xf32>
      %78 = vector.broadcast %77 : f32 to vector<1x8x128xf32>
      %c0_42 = arith.constant 0 : index
      %c0_43 = arith.constant 0 : index
      %c0_44 = arith.constant 0 : index
      %79 = vector.load %arg8[%c0_42, %c0_43, %c0_44] : memref<1x8x128xf32, #tpu.memory_space<vmem>>, vector<1x8x128xf32>
      tpu.vector_store %arg8[%c0_42, %c0_43, %c0_44], %78 {strides = array<i32>} : memref<1x8x128xf32, #tpu.memory_space<vmem>>, vector<1x8x128xf32>,
    } else {
    }
    return
  }
  func.func @transform_0(%arg0: i32, %arg1: i32) -> (i32, i32) {
    %c0_i32 = arith.constant 0 : i32
    %c0_i32_0 = arith.constant 0 : i32
    return %arg0, %c0_i32 : i32, i32
  }
  func.func @transform_1(%arg0: i32, %arg1: i32) -> (i32, i32) {
    %c0_i32 = arith.constant 0 : i32
    %c0_i32_0 = arith.constant 0 : i32
    return %arg1, %c0_i32 : i32, i32
  }
  func.func @transform_2(%arg0: i32, %arg1: i32) -> (i32, i32) {
    %c0_i32 = arith.constant 0 : i32
    %c0_i32_0 = arith.constant 0 : i32
    return %arg0, %c0_i32 : i32, i32
  }
  func.func @transform_3(%arg0: i32, %arg1: i32) -> (i32, i32) {
    %c0_i32 = arith.constant 0 : i32
    %c0_i32_0 = arith.constant 0 : i32
    return %c0_i32, %arg1 : i32, i32
  }
  func.func @transform_4(%arg0: i32, %arg1: i32) -> (i32, i32) {
    %c0_i32 = arith.constant 0 : i32
    %c0_i32_0 = arith.constant 0 : i32
    return %arg0, %c0_i32 : i32, i32
  }
  func.func @transform_5(%arg0: i32, %arg1: i32) -> (i32, i32) {
    %c0_i32 = arith.constant 0 : i32
    %c0_i32_0 = arith.constant 0 : i32
    return %c0_i32, %arg1 : i32, i32
  }
  func.func @transform_6(%arg0: i32, %arg1: i32) -> (i32, i32, i32) {
    %c0_i32 = arith.constant 0 : i32
    %c0_i32_0 = arith.constant 0 : i32
    %c0_i32_1 = arith.constant 0 : i32
    return %arg0, %c0_i32, %c0_i32_0 : i32, i32, i32
  }
}

</mosaic_0001>

<bundles_post_ra>
// kernel: tpu_custom_call.1
= control target key start
LH: loop header
LB: loop body
LE: loop exit
PB: predicated region body
PF: predicated region fallthrough
CT: control target
= control target key end

     0   :  { %11 = vsyncpa [#allocation5], 0  ;;  %s3995_s0 = inlined_call_operand.vmem [shape: f32[256,128], index: 0, kind: input, shape index: {}]   ;;  %s3996_s1 = inlined_call_operand.vmem [shape: f32[256,128], index: 1, kind: input, shape index: {}]   ;;  %s3997_s2 = inlined_call_operand.vmem [shape: f32[256,1], index: 2, kind: input, shape index: {}]   ;;  %s3998_s3 = inlined_call_operand.vmem [shape: f32[1,256], index: 3, kind: input, shape index: {}]   ;;  %s3999_s4 = inlined_call_operand.vmem [shape: s32[256,1], index: 4, kind: input, shape index: {}]   ;;  %s4000_s5 = inlined_call_operand.hbm [shape: s32[1,256], index: 5, kind: input, shape index: {}]   ;;  %s4001_s6 = inlined_call_operand.hbm [shape: f32[2,8,128], index: 6, kind: output, shape index: {}]  }
   0x1   :  { %12 = vsyncpa [#allocation6], 0 }
   0x2   :  { %14 = vsyncpa [#allocation6 + $0x1], 0  ;;  %s2444_s21 = smov 0   ;;  %s2446_s22 = smov 0  }
   0x3   :  { %s2448_s23 = smov 0   ;;  %s2450_s24 = smov 0  }
   0x4   :  { %s2452_s25 = smov 0   ;;  %s2454_s26 = smov 0  }
   0x5 LB: > { %s2040_s27 = sadd.s32 4294967295, %s2405_s26   ;;  %s2041_s28 = sadd.s32 4294967294, %s2405_s26   ;;  %s2405_s26 = sphi %s2454_s26, %s20_s26   ;;  %s2401_s25 = sphi %s2452_s25, %s4069_s25   ;;  %s2397_s24 = sphi %s2450_s24, %s4068_s24   ;;  %s2393_s23 = sphi %s2448_s23, %s4067_s23   ;;  %s2389_s22 = sphi %s2446_s22, %s4066_s22   ;;  %s2385_s21 = sphi %s2444_s21, %s4065_s21  }
   0x6   : > { %s32_s29 = sadd.s32 1, %s2401_s25  ;;  %s195_s30 = sadd.s32 1, %s2393_s23 }
   0x7   : > { %p34_p0 = scmp.ge.s32.totalorder %s32_s29, 2  ;;  %p205_p1 = scmp.ne.s32.totalorder %s2393_s23, %s2389_s22 }
   0x8   : > { %p206_p2 = scmp.eq.s32.totalorder %s2040_s27, 1  ;;  %p211_p3 = scmp.ne.s32.totalorder %s2389_s22, %s2385_s21 }
   0x9   : > { %s4071_s29 = smov (%p34_p0, %s32_s29), 0  ;;  %p212_p5 = scmp.eq.s32.totalorder %s2041_s28, 1 }
   0xa   : > { %p2484_p4 = por %p206_p2, %p205_p1  ;;  %s192_s8 = ssub.s32 %s2401_s25, %s4071_s29 }
   0xb   : > { %p2042_p6 = scmp.ge.s32.totalorder %s2405_s26, 1  ;;  %p193_p7 = scmp.eq.s32.totalorder %s192_s8, 0 }
   0xc   : > { %p2491_p8 = por %p212_p5, %p211_p3  ;;  %p219_p9 = scmp.lt.s32.totalorder %s2405_s26, 3 }
   0xd   : > { %s2497_s10 = scalar_select %p193_p7, %s2393_s23, %s195_s30  }
   0xe   : > { %p220_p10 = pnand %p2042_p6, %p219_p9  ;;  %p2109_p11 = scmp.eq.s32.totalorder %s2040_s27, 0 }
   0xf   : > { %s250_s13 = sshll.u32 %s4000_s5, 4  ;;  %s2407_s14 = smov [#allocation4]   ;;  %s251_s13 = int_to_ptr.hbm [resolvable:$true] %s250_s13 }
  0x10   : > { %p2101_p12 = pneg %p220_p10  ;;  %s252_s15 = sshll.u32 %s2407_s14, 4  ;;  %s253_s15 = int_to_ptr.vmem [resolvable:$true] %s252_s15 }
  0x11   : > { %292 = sbr.rel (%p220_p10) target bundleno = 749 (0x2ed), region = 44 }
  0x12   : > { %p2102_p13 = pnand %p2109_p11, %p2101_p12 }
  0x14   : > { %2104 = dma.hbm_to_vmem [thread:$0]  (!%p2102_p13), %s251_s13, 32, %s253_s15, [#allocation5]  }
  0x16   : > { %2376 = dma.done.wait (%p2109_p11), [#allocation5], 32  }
  0x17   : > { %2378 = vsyncadd (%p2109_p11), [#allocation5], 4294967264  ;;  %s2050_s16 = sshll.u32 %s2397_s24, 4  ;;  %v440_v0 = vld [vmem:[%s3996_s1 + $0x78] sm:$0xff]  ;;  %v439_v2 = vld [vmem:[%s3996_s1 + $0x70] sm:$0xff]  ;;  %v2408_v4 = vmov 0  }
  0x18   : > { %p343_p0 = scmp.lt.s32.totalorder %s2050_s16, 31  ;;  %v456_v1 = vld [vmem:[%s3996_s1 + $0xf8] sm:$0xff]  ;;  %457 = vmatpush.xpose.msra.mxu0 %v440_v0  ;;  %2061 = vmatpush.xpose.msra.mxu2 %v440_v0  ;;  %v455_v3 = vld [vmem:[%s3996_s1 + $0xf0] sm:$0xff]  ;;  %v438_v5 = vld [vmem:[%s3996_s1 + $0x68] sm:$0xff]  ;;  %s339_s18 = sand.u32 1, %s2389_s22  }
  0x19   : > { %522 = vmatpush.xpose.msra.mxu1 %v456_v1  ;;  %2077 = vmatpush.xpose.msra.mxu3 %v456_v1  ;;  %v454_v7 = vld [vmem:[%s3996_s1 + $0xe8] sm:$0xff]  ;;  %v437_v8 = vld [vmem:[%s3996_s1 + $0x60] sm:$0xff]  ;;  %v436_v10 = vld [vmem:[%s3996_s1 + $0x58] sm:$0xff]  ;;  %s2049_s19 = sshll.u32 %s339_s18, 3  ;;  %s2058_s20 = sshll.u32 %s2397_s24, 3 }
  0x1a   : > { %s4073_s16 = smov (!%p343_p0, %s2050_s16), 31  ;;  %2162 = vset.pattern.permute.xlu0 %v2408_v4  ;;  %2163 = vset.pattern.permute.xlu1 %v2408_v4  ;;  %v453_v9 = vld [vmem:[%s3996_s1 + $0xe0] sm:$0xff]  ;;  %v452_v12 = vld [vmem:[%s3996_s1 + $0xd8] sm:$0xff]  ;;  %v435_v13 = vld [vmem:[%s3996_s1 + $0x50] sm:$0xff]  ;;  %s341_s11 = scalar_lea.vmem [#allocation7], %s2049_s19 }
  0x1b   : > { %s2509_s27 = sshll.u32 %s4073_s16, 3  ;;  %2164 = vset.pattern.permute.xlu2 %v2408_v4  ;;  %v451_v14 = vld [vmem:[%s3996_s1 + $0xd0] sm:$0xff]  ;;  %v434_v15 = vld [vmem:[%s3996_s1 + $0x48] sm:$0xff]  ;;  %v433_v19 = vld [vmem:[%s3996_s1 + $0x40] sm:$0xff]  ;;  %s1905_s12 = sshll.u32 %s341_s11, 4  ;;  %s1906_s12 = int_to_ptr.vmem [resolvable:$true] %s1905_s12 }
  0x1c   : > { %s2521_s14 = scalar_lea.vmem %s3999_s4, %s2509_s27  ;;  %458 = vmatpush.xpose.msra.mxu0 %v439_v2  ;;  %2062 = vmatpush.xpose.msra.mxu2 %v439_v2  ;;  %v450_v18 = vld [vmem:[%s3996_s1 + $0xc8] sm:$0xff]  ;;  %v449_v21 = vld [vmem:[%s3996_s1 + $0xc0] sm:$0xff]  ;;  %v432_v22 = vld [vmem:[%s3996_s1 + $0x38] sm:$0xff]  ;;  %s2624_s8 = scalar_lea.vmem %s3995_s0, %s2509_s27 }
  0x1d   : > { %523 = vmatpush.xpose.msra.mxu1 %v455_v3  ;;  %2078 = vmatpush.xpose.msra.mxu3 %v455_v3  ;;  %v657_v6 = vld [vmem:[%s2521_s14] sm:$0xff]  ;;  %v658_v11 = vld [vmem:[%s2521_s14 + $0x8] sm:$0xff]  ;;  %v659_v16 = vld [vmem:[%s2521_s14 + $0x10] sm:$0xff]  ;;  %s2922_s17 = scalar_lea.vmem %s3997_s2, %s2509_s27  ;;  %s2056_s27 = sshll.u32 %s2397_s24, 7 }
  0x1e   : > { %675 = vperm.xlu0 %2162, %v657_v6   ;;  %v663_v17 = vld [vmem:[%s2521_s14 + $0x30] sm:$0xff]  ;;  %681 = vperm.xlu1 %2163, %v659_v16   ;;  %v661_v20 = vld [vmem:[%s2521_s14 + $0x20] sm:$0xff]  ;;  %v660_v23 = vld [vmem:[%s2521_s14 + $0x18] sm:$0xff]  ;;  %s1893_s15 = scalar_lea.sflag [#allocation6], %s339_s18 }
  0x1f   : > { %687 = vperm.xlu2 %2164, %v661_v20   ;;  %v666_v24 = vld [vmem:[%s2521_s14 + $0x48] sm:$0xff]  ;;  %v448_v25 = vld [vmem:[%s3996_s1 + $0xb8] sm:$0xff]  ;;  %v431_v27 = vld [vmem:[%s3996_s1 + $0x30] sm:$0xff] }
  0x20   : > { %459 = vmatpush.xpose.msra.mxu0 %v438_v5  ;;  %2063 = vmatpush.xpose.msra.mxu2 %v438_v5  ;;  %v662_v26 = vld [vmem:[%s2521_s14 + $0x28] sm:$0xff]  ;;  %v447_v28 = vld [vmem:[%s3996_s1 + $0xb0] sm:$0xff]  ;;  %v664_v29 = vld [vmem:[%s2521_s14 + $0x38] sm:$0xff] }
  0x21   : > { %524 = vmatpush.xpose.msra.mxu1 %v454_v7  ;;  %2079 = vmatpush.xpose.msra.mxu3 %v454_v7  ;;  %v669_v30 = vld [vmem:[%s2521_s14 + $0x60] sm:$0xff]  ;;  %v430_v31 = vld [vmem:[%s3996_s1 + $0x28] sm:$0xff]  ;;  %v667_v36 = vld [vmem:[%s2521_s14 + $0x50] sm:$0xff] }
  0x22   : > { %v446_v32 = vld [vmem:[%s3996_s1 + $0xa8] sm:$0xff]  ;;  %v665_v33 = vld [vmem:[%s2521_s14 + $0x40] sm:$0xff]  ;;  %v672_v37 = vld [vmem:[%s2521_s14 + $0x78] sm:$0xff] }
  0x23   : > { %v429_v34 = vld [vmem:[%s3996_s1 + $0x20] sm:$0xff]  ;;  %v428_v38 = vld [vmem:[%s3996_s1 + $0x18] sm:$0xff]  ;;  %v427_v41 = vld [vmem:[%s3996_s1 + $0x10] sm:$0xff] }
  0x24   : > { %460 = vmatpush.xpose.msra.mxu0 %v437_v8  ;;  %2064 = vmatpush.xpose.msra.mxu2 %v437_v8  ;;  %v445_v35 = vld [vmem:[%s3996_s1 + $0xa0] sm:$0xff]  ;;  %v444_v39 = vld [vmem:[%s3996_s1 + $0x98] sm:$0xff]  ;;  %v443_v42 = vld [vmem:[%s3996_s1 + $0x90] sm:$0xff] }
  0x25   : > { %525 = vmatpush.xpose.msra.mxu1 %v453_v9  ;;  %2080 = vmatpush.xpose.msra.mxu3 %v453_v9  ;;  %v668_v40 = vld [vmem:[%s2521_s14 + $0x58] sm:$0xff]  ;;  %v670_v43 = vld [vmem:[%s2521_s14 + $0x68] sm:$0xff]  ;;  %v671_v46 = vld [vmem:[%s2521_s14 + $0x70] sm:$0xff] }
  0x26   : > { %678 = vperm.xlu0 %2162, %v658_v11   ;;  %684 = vperm.xlu1 %2163, %v660_v23   ;;  %v426_v44 = vld [vmem:[%s3996_s1 + $0x8] sm:$0xff]  ;;  %v425_v47 = vld [vmem:[%s3996_s1] sm:$0xff]  ;;  %v411_v53 = vld [vmem:[%s2624_s8 + $0x10] sm:$0xff] }
  0x27   : > { %690 = vperm.xlu2 %2164, %v662_v26   ;;  %v442_v45 = vld [vmem:[%s3996_s1 + $0x88] sm:$0xff]  ;;  %v441_v48 = vld [vmem:[%s3996_s1 + $0x80] sm:$0xff]  ;;  %v419_v54 = vld [vmem:[%s2624_s8 + $0x50] sm:$0xff] }
  0x28   : > { %461 = vmatpush.xpose.msra.mxu0 %v436_v10  ;;  %2065 = vmatpush.xpose.msra.mxu2 %v436_v10  ;;  %v409_v49 = vld [vmem:[%s2624_s8] sm:$0xff]  ;;  %v410_v51 = vld [vmem:[%s2624_s8 + $0x8] sm:$0xff]  ;;  %v412_v55 = vld [vmem:[%s2624_s8 + $0x18] sm:$0xff] }
  0x29   : > { %526 = vmatpush.xpose.msra.mxu1 %v452_v12  ;;  %2081 = vmatpush.xpose.msra.mxu3 %v452_v12  ;;  %v417_v50 = vld [vmem:[%s2624_s8 + $0x40] sm:$0xff]  ;;  %v418_v52 = vld [vmem:[%s2624_s8 + $0x48] sm:$0xff]  ;;  %v420_v56 = vld [vmem:[%s2624_s8 + $0x58] sm:$0xff] }
  0x2a   : > { %v413_v57 = vld [vmem:[%s2624_s8 + $0x20] sm:$0xff]  ;;  %v414_v59 = vld [vmem:[%s2624_s8 + $0x28] sm:$0xff]  ;;  %v415_v61 = vld [vmem:[%s2624_s8 + $0x30] sm:$0xff] }
  0x2b   : > { %v421_v58 = vld [vmem:[%s2624_s8 + $0x60] sm:$0xff]  ;;  %v422_v60 = vld [vmem:[%s2624_s8 + $0x68] sm:$0xff]  ;;  %v423_v62 = vld [vmem:[%s2624_s8 + $0x70] sm:$0xff] }
  0x2c   : > { %462 = vmatpush.xpose.msra.mxu0 %v435_v13  ;;  %2066 = vmatpush.xpose.msra.mxu2 %v435_v13  ;;  %v416_v63 = vld [vmem:[%s2624_s8 + $0x38] sm:$0xff]  ;;  %v587_v4 = vld [vmem:[%s3998_s3] sm:$0x3] }
  0x2d   : > { %527 = vmatpush.xpose.msra.mxu1 %v451_v14  ;;  %2082 = vmatpush.xpose.msra.mxu3 %v451_v14  ;;  %v424_v0 = vld [vmem:[%s2624_s8 + $0x78] sm:$0xff]  ;;  %v673_v5 = vld [vmem:[#allocation4] sm:$0x3]  ;;  %v2656_v8 = vperm.slane %v587_v4, 0  ;;  %v2660_v11 = vperm.slane %v587_v4, 1  ;;  %s1903_s8 = scalar_lea.hbm %s4001_s6, %s2058_s20  ;;  %s2343_s20 = scalar_lea.hbm %s4001_s6, 16 }
  0x2e   : > { %693 = vperm.xlu0 %2162, %v663_v17   ;;  %696 = vperm.xlu1 %2163, %v664_v29   ;;  %v2658_v9 = vperm.slane %v673_v5, 0  ;;  %v2662_v12 = vperm.slane %v673_v5, 1  ;;  %s1907_s14 = sshll.u32 %s1903_s8, 4  ;;  %s1908_s14 = int_to_ptr.hbm [resolvable:$true] %s1907_s14 }
  0x2f   : > { %699 = vperm.xlu2 %2164, %v665_v33   ;;  %s2337_s16 = sshra.s32 %s1908_s14, 4  ;;  %s2338_s16 = int_to_ptr.hbm [resolvable:$true] %s2337_s16 }
  0x30   : > { %463 = vmatpush.xpose.msra.mxu0 %v434_v15  ;;  %2067 = vmatpush.xpose.msra.mxu2 %v434_v15  ;;  %p2344_p5 = scmp.lt.s32.totalorder %s2338_s16, %s4001_s6 }
  0x31   : > { %528 = vmatpush.xpose.msra.mxu1 %v450_v18  ;;  %2083 = vmatpush.xpose.msra.mxu3 %v450_v18 }
  0x34   : > { %464 = vmatpush.xpose.msra.mxu0 %v433_v19  ;;  %2068 = vmatpush.xpose.msra.mxu2 %v433_v19 }
  0x35   : > { %529 = vmatpush.xpose.msra.mxu1 %v449_v21  ;;  %2084 = vmatpush.xpose.msra.mxu3 %v449_v21 }
  0x36   : > { %702 = vperm.xlu0 %2162, %v666_v24   ;;  %705 = vperm.xlu1 %2163, %v667_v36  }
  0x37   : > { %708 = vperm.xlu2 %2164, %v668_v40  }
  0x38   : > { %465 = vmatpush.xpose.msra.mxu0 %v432_v22  ;;  %2069 = vmatpush.xpose.msra.mxu2 %v432_v22 }
  0x39   : > { %530 = vmatpush.xpose.msra.mxu1 %v448_v25  ;;  %2085 = vmatpush.xpose.msra.mxu3 %v448_v25 }
  0x3c   : > { %466 = vmatpush.xpose.msra.mxu0 %v431_v27  ;;  %2070 = vmatpush.xpose.msra.mxu2 %v431_v27 }
  0x3d   : > { %531 = vmatpush.xpose.msra.mxu1 %v447_v28  ;;  %2086 = vmatpush.xpose.msra.mxu3 %v447_v28 }
  0x3e   : > { %711 = vperm.xlu0 %2162, %v669_v30   ;;  %714 = vperm.xlu1 %2163, %v670_v43  }
  0x3f   : > { %717 = vperm.xlu2 %2164, %v671_v46  }
  0x40   : > { %467 = vmatpush.xpose.msra.mxu0 %v430_v31  ;;  %2071 = vmatpush.xpose.msra.mxu2 %v430_v31 }
  0x41   : > { %532 = vmatpush.xpose.msra.mxu1 %v446_v32  ;;  %2087 = vmatpush.xpose.msra.mxu3 %v446_v32 }
  0x44   : > { %468 = vmatpush.xpose.msra.mxu0 %v429_v34  ;;  %2072 = vmatpush.xpose.msra.mxu2 %v429_v34 }
  0x45   : > { %533 = vmatpush.xpose.msra.mxu1 %v445_v35  ;;  %2088 = vmatpush.xpose.msra.mxu3 %v445_v35 }
  0x46   : > { %720 = vperm.xlu0 %2162, %v672_v37  }
  0x48   : > { %469 = vmatpush.xpose.msra.mxu0 %v428_v38  ;;  %2073 = vmatpush.xpose.msra.mxu2 %v428_v38 }
  0x49   : > { %534 = vmatpush.xpose.msra.mxu1 %v444_v39  ;;  %2089 = vmatpush.xpose.msra.mxu3 %v444_v39 }
  0x4c   : > { %470 = vmatpush.xpose.msra.mxu0 %v427_v41  ;;  %2074 = vmatpush.xpose.msra.mxu2 %v427_v41 }
  0x4d   : > { %535 = vmatpush.xpose.msra.mxu1 %v443_v42  ;;  %2090 = vmatpush.xpose.msra.mxu3 %v443_v42 }
  0x50   : > { %471 = vmatpush.xpose.msra.mxu0 %v426_v44  ;;  %2075 = vmatpush.xpose.msra.mxu2 %v426_v44 }
  0x51   : > { %536 = vmatpush.xpose.msra.mxu1 %v442_v45  ;;  %2091 = vmatpush.xpose.msra.mxu3 %v442_v45 }
  0x54   : > { %472 = vmatpush.xpose.msra.mxu0 %v425_v47  ;;  %2076 = vmatpush.xpose.msra.mxu2 %v425_v47 }
  0x55   : > { %537 = vmatpush.xpose.msra.mxu1 %v441_v48  ;;  %2092 = vmatpush.xpose.msra.mxu3 %v441_v48 }
  0x57   : > { %473 = vmatmul.f32.vlgmr.msra.gmra.mxu0 %v409_v49  ;;  %497 = vmatmul.f32.vlgmr.msra.gmra.mxu2 %v417_v50 }
  0x58   : > { %538 = vmatmul.f32.vlgmr.msra.gmra.mxu1 %v409_v49  ;;  %562 = vmatmul.f32.vlgmr.msra.gmra.mxu3 %v417_v50 }
  0x5f   : > { %476 = vmatmul.f32.gmra.mxu0 %v410_v51  ;;  %500 = vmatmul.f32.gmra.mxu2 %v418_v52 }
  0x60   : > { %541 = vmatmul.f32.gmra.mxu1 %v410_v51  ;;  %565 = vmatmul.f32.gmra.mxu3 %v418_v52 }
  0x67   : > { %479 = vmatmul.f32.gmra.mxu0 %v411_v53  ;;  %503 = vmatmul.f32.gmra.mxu2 %v419_v54 }
  0x68   : > { %544 = vmatmul.f32.gmra.mxu1 %v411_v53  ;;  %568 = vmatmul.f32.gmra.mxu3 %v419_v54 }
  0x6f   : > { %482 = vmatmul.f32.gmra.mxu0 %v412_v55  ;;  %506 = vmatmul.f32.gmra.mxu2 %v420_v56 }
  0x70   : > { %547 = vmatmul.f32.gmra.mxu1 %v412_v55  ;;  %571 = vmatmul.f32.gmra.mxu3 %v420_v56 }
  0x77   : > { %485 = vmatmul.f32.gmra.mxu0 %v413_v57  ;;  %509 = vmatmul.f32.gmra.mxu2 %v421_v58 }
  0x78   : > { %550 = vmatmul.f32.gmra.mxu1 %v413_v57  ;;  %574 = vmatmul.f32.gmra.mxu3 %v421_v58 }
  0x79   : > { %v2645_v2 = vpop.permute.xlu2 %687 }
  0x7a   : > { %vm732_vm14 = vcmp.eq.s32.totalorder %v2645_v2, %v2658_v9  ;;  %vm733_vm15 = vcmp.eq.s32.totalorder %v2645_v2, %v2662_v12 }
  0x7f   : > { %488 = vmatmul.f32.gmra.mxu0 %v414_v59  ;;  %512 = vmatmul.f32.gmra.mxu2 %v422_v60 }
  0x80   : > { %553 = vmatmul.f32.gmra.mxu1 %v414_v59  ;;  %577 = vmatmul.f32.gmra.mxu3 %v422_v60 }
  0x81   : > { %v2654_v7 = vpop.permute.xlu2 %690 }
  0x87   : > { %491 = vmatmul.f32.gmra.mxu0 %v415_v61  ;;  %515 = vmatmul.f32.gmra.mxu2 %v423_v62 }
  0x88   : > { %556 = vmatmul.f32.gmra.mxu1 %v415_v61  ;;  %580 = vmatmul.f32.gmra.mxu3 %v423_v62 }
  0x89   : > { %v700_v31 = vpop.permute.xlu2 %699 }
  0x8a   : > { %vm740_vm2 = vcmp.eq.s32.totalorder %v700_v31, %v2658_v9  ;;  %vm741_vm3 = vcmp.eq.s32.totalorder %v700_v31, %v2662_v12 }
  0x8f   : > { %494 = vmatmul.f32.gmra.mxu0 %v416_v63  ;;  %518 = vmatmul.f32.gmra.mxu2 %v424_v0 }
  0x90   : > { %559 = vmatmul.f32.gmra.mxu1 %v416_v63  ;;  %583 = vmatmul.f32.gmra.mxu3 %v424_v0  ;;  %v676_v1 = vpop.permute.xlu0 %675  ;;  %v2647_v3 = vpop.permute.xlu1 %681 }
  0x91   : > { %vm724_vm0 = vcmp.eq.s32.totalorder %v676_v1, %v2658_v9  ;;  %vm725_vm1 = vcmp.eq.s32.totalorder %v676_v1, %v2662_v12  ;;  %vm728_vm8 = vcmp.eq.s32.totalorder %v2647_v3, %v2658_v9  ;;  %vm729_vm9 = vcmp.eq.s32.totalorder %v2647_v3, %v2662_v12 }
  0x98   : > { %v2652_v6 = vpop.permute.xlu0 %678  ;;  %v2667_v17 = vpop.permute.xlu1 %684 }
  0x99   : > { %vm726_vm4 = vcmp.eq.s32.totalorder %v2652_v6, %v2658_v9  ;;  %vm727_vm5 = vcmp.eq.s32.totalorder %v2652_v6, %v2662_v12  ;;  %vm730_vm12 = vcmp.eq.s32.totalorder %v2667_v17, %v2658_v9  ;;  %vm731_vm13 = vcmp.eq.s32.totalorder %v2667_v17, %v2662_v12 }
  0xa0   : > { %v2670_v24 = vpop.permute.xlu0 %693  ;;  %v2678_v47 = vpop.permute.xlu1 %696 }
  0xa8   : > { %v703_v56 = vpop.permute.xlu0 %702 }
  0xa9   : > { %vm742_vm6 = vcmp.eq.s32.totalorder %v703_v56, %v2658_v9  ;;  %vm743_vm7 = vcmp.eq.s32.totalorder %v703_v56, %v2662_v12 }
  0xd4   : > { %v474_v10 = vpop.f32.mrf.mxu0 }
  0xd5   : > { %v588_v13 = vmul.f32 2.0, %v474_v10  ;;  %v539_v14 = vpop.f32.mrf.mxu1 }
  0xd6   : > { %v589_v15 = vmul.f32 2.0, %v539_v14 }
  0xd7   : > { %v625_v16 = vsub.f32 %v2656_v8, %v588_v13 }
  0xd8   : > { %v626_v18 = vsub.f32 %v2660_v11, %v589_v15 }
  0xd9   : > { %v788_v19 = vsel %vm724_vm0, 1e+30, %v625_v16  ;;  %v756_v20 = vsel %vm724_vm0, %v625_v16, -1e+30 }
  0xda   : > { %v498_v21 = vpop.f32.mrf.mxu2  ;;  %v789_v22 = vsel %vm725_vm1, 1e+30, %v626_v18  ;;  %v757_v23 = vsel %vm725_vm1, %v626_v18, -1e+30 }
  0xdb   : > { %v604_v25 = vmul.f32 2.0, %v498_v21  ;;  %v563_v26 = vpop.f32.mrf.mxu3  ;;  %v836_v27 = vmin.f32 %v788_v19, %v789_v22  ;;  %v820_v28 = vmax.f32 %v756_v20, %v757_v23  ;;  %v706_v22 = vpop.permute.xlu1 %705 }
  0xdc   : > { %v605_v29 = vmul.f32 2.0, %v563_v26  ;;  %v477_v30 = vpop.f32.mrf.mxu0  ;;  %vm744_vm10 = vcmp.eq.s32.totalorder %v706_v22, %v2658_v9  ;;  %vm745_vm11 = vcmp.eq.s32.totalorder %v706_v22, %v2662_v12 }
  0xdd   : > { %v641_v32 = vsub.f32 %v2656_v8, %v604_v25  ;;  %v590_v33 = vmul.f32 2.0, %v477_v30  ;;  %v542_v34 = vpop.f32.mrf.mxu1  ;;  %v916_v35 = vmin.f32 %v836_v27, 1e+30  ;;  %v868_v36 = vmax.f32 %v820_v28, -1e+30 }
  0xde   : > { %v642_v37 = vsub.f32 %v2660_v11, %v605_v29  ;;  %v591_v38 = vmul.f32 2.0, %v542_v34 }
  0xdf   : > { %1047 = vmin.xlane.f32.xlu0 %v916_v35  ;;  %983 = vmax.xlane.f32.xlu1 %v868_v36  ;;  %v804_v39 = vsel %vm740_vm2, 1e+30, %v641_v32  ;;  %v772_v40 = vsel %vm740_vm2, %v641_v32, -1e+30  ;;  %v627_v41 = vsub.f32 %v2656_v8, %v590_v33  ;;  %vm734_vm2 = vcmp.eq.s32.totalorder %v2654_v7, %v2658_v9 }
  0xe0   : > { %v628_v42 = vsub.f32 %v2660_v11, %v591_v38  ;;  %v805_v43 = vsel %vm741_vm3, 1e+30, %v642_v37  ;;  %v773_v44 = vsel %vm741_vm3, %v642_v37, -1e+30  ;;  %vm735_vm3 = vcmp.eq.s32.totalorder %v2654_v7, %v2662_v12 }
  0xe1   : > { %v844_v45 = vmin.f32 %v804_v39, %v805_v43  ;;  %v828_v46 = vmax.f32 %v772_v40, %v773_v44  ;;  %v758_v54 = vsel %vm726_vm4, %v627_v41, -1e+30  ;;  %v790_v26 = vsel %vm726_vm4, 1e+30, %v627_v41 }
  0xe2   : > { %v501_v48 = vpop.f32.mrf.mxu2  ;;  %v759_v55 = vsel %vm727_vm5, %v628_v42, -1e+30  ;;  %v791_v27 = vsel %vm727_vm5, 1e+30, %v628_v42 }
  0xe3   : > { %v606_v49 = vmul.f32 2.0, %v501_v48  ;;  %v566_v50 = vpop.f32.mrf.mxu3  ;;  %v924_v51 = vmin.f32 %v844_v45, 1e+30  ;;  %v876_v59 = vmax.f32 %v828_v46, -1e+30  ;;  %v821_v0 = vmax.f32 %v758_v54, %v759_v55 }
  0xe4   : > { %v607_v52 = vmul.f32 2.0, %v566_v50  ;;  %v480_v53 = vpop.f32.mrf.mxu0  ;;  %v837_v36 = vmin.f32 %v790_v26, %v791_v27 }
  0xe5   : > { %v643_v57 = vsub.f32 %v2656_v8, %v606_v49  ;;  %1063 = vmin.xlane.f32.xlu2 %v924_v51  ;;  %v545_v58 = vpop.f32.mrf.mxu1  ;;  %v592_v61 = vmul.f32 2.0, %v480_v53  ;;  %v869_v21 = vmax.f32 %v821_v0, -1e+30 }
  0xe6   : > { %v644_v60 = vsub.f32 %v2660_v11, %v607_v52  ;;  %v593_v62 = vmul.f32 2.0, %v545_v58  ;;  %v917_v45 = vmin.f32 %v837_v36, 1e+30 }
  0xe7   : > { %999 = vmax.xlane.f32.xlu1 %v876_v59  ;;  %v774_v63 = vsel %vm742_vm6, %v643_v57, -1e+30  ;;  %v806_v1 = vsel %vm742_vm6, 1e+30, %v643_v57  ;;  %v629_v14 = vsub.f32 %v2656_v8, %v592_v61 }
  0xe8   : > { %v775_v4 = vsel %vm743_vm7, %v644_v60, -1e+30  ;;  %v807_v5 = vsel %vm743_vm7, 1e+30, %v644_v60  ;;  %v630_v15 = vsub.f32 %v2660_v11, %v593_v62 }
  0xe9   : > { %v829_v10 = vmax.f32 %v774_v63, %v775_v4  ;;  %v845_v13 = vmin.f32 %v806_v1, %v807_v5  ;;  %v760_v34 = vsel %vm728_vm8, %v629_v14, -1e+30  ;;  %v792_v46 = vsel %vm728_vm8, 1e+30, %v629_v14 }
  0xea   : > { %v504_v16 = vpop.f32.mrf.mxu2  ;;  %v761_v6 = vsel %vm729_vm9, %v630_v15, -1e+30  ;;  %v793_v49 = vsel %vm729_vm9, 1e+30, %v630_v15  ;;  %v709_v15 = vpop.permute.xlu2 %708  ;;  %vm736_vm8 = vcmp.eq.s32.totalorder %v2670_v24, %v2658_v9  ;;  %vm737_vm9 = vcmp.eq.s32.totalorder %v2670_v24, %v2662_v12 }
  0xeb   : > { %v608_v18 = vmul.f32 2.0, %v504_v16  ;;  %v569_v19 = vpop.f32.mrf.mxu3  ;;  %v877_v20 = vmax.f32 %v829_v10, -1e+30  ;;  %v925_v31 = vmin.f32 %v845_v13, 1e+30  ;;  %v822_v41 = vmax.f32 %v760_v34, %v761_v6  ;;  %v715_v34 = vpop.permute.xlu1 %714 }
  0xec   : > { %v609_v23 = vmul.f32 2.0, %v569_v19  ;;  %v483_v25 = vpop.f32.mrf.mxu0  ;;  %v838_v59 = vmin.f32 %v792_v46, %v793_v49  ;;  %vm746_vm0 = vcmp.eq.s32.totalorder %v709_v15, %v2658_v9  ;;  %vm747_vm1 = vcmp.eq.s32.totalorder %v709_v15, %v2662_v12 }
  0xed   : > { %v645_v28 = vsub.f32 %v2656_v8, %v608_v18  ;;  %v548_v29 = vpop.f32.mrf.mxu1  ;;  %1001 = vmax.xlane.f32.xlu0 %v877_v20  ;;  %985 = vmax.xlane.f32.xlu2 %v869_v21  ;;  %v594_v30 = vmul.f32 2.0, %v483_v25  ;;  %v870_v54 = vmax.f32 %v822_v41, -1e+30  ;;  %vm750_vm6 = vcmp.eq.s32.totalorder %v715_v34, %v2658_v9 }
  0xee   : > { %v646_v32 = vsub.f32 %v2660_v11, %v609_v23  ;;  %v595_v33 = vmul.f32 2.0, %v548_v29  ;;  %v918_v13 = vmin.f32 %v838_v59, 1e+30  ;;  %vm751_vm7 = vcmp.eq.s32.totalorder %v715_v34, %v2662_v12 }
  0xef   : > { %1065 = vmin.xlane.f32.xlu1 %v925_v31  ;;  %v808_v35 = vsel %vm744_vm10, 1e+30, %v645_v28  ;;  %v631_v38 = vsub.f32 %v2656_v8, %v594_v30  ;;  %v776_v5 = vsel %vm744_vm10, %v645_v28, -1e+30  ;;  %v2774_v31 = vpop.permute.xlu0 %711 }
  0xf0   : > { %v632_v37 = vsub.f32 %v2660_v11, %v595_v33  ;;  %v809_v39 = vsel %vm745_vm11, 1e+30, %v646_v32  ;;  %v777_v17 = vsel %vm745_vm11, %v646_v32, -1e+30  ;;  %vm748_vm4 = vcmp.eq.s32.totalorder %v2774_v31, %v2658_v9 }
  0xf1   : > { %v846_v40 = vmin.f32 %v808_v35, %v809_v39  ;;  %v762_v50 = vsel %vm730_vm12, %v631_v38, -1e+30  ;;  %v794_v55 = vsel %vm730_vm12, 1e+30, %v631_v38  ;;  %v830_v25 = vmax.f32 %v776_v5, %v777_v17 }
  0xf2   : > { %v507_v42 = vpop.f32.mrf.mxu2  ;;  %v763_v51 = vsel %vm731_vm13, %v632_v37, -1e+30  ;;  %v795_v58 = vsel %vm731_vm13, 1e+30, %v632_v37  ;;  %vm749_vm5 = vcmp.eq.s32.totalorder %v2774_v31, %v2662_v12  ;;  %vm738_vm12 = vcmp.eq.s32.totalorder %v2678_v47, %v2658_v9 }
  0xf3   : > { %v572_v43 = vpop.f32.mrf.mxu3  ;;  %v926_v44 = vmin.f32 %v846_v40, 1e+30  ;;  %v610_v56 = vmul.f32 2.0, %v507_v42  ;;  %v823_v60 = vmax.f32 %v762_v50, %v763_v51  ;;  %v839_v63 = vmin.f32 %v794_v55, %v795_v58 }
  0xf4   : > { %v486_v48 = vpop.f32.mrf.mxu0  ;;  %v611_v3 = vmul.f32 2.0, %v572_v43  ;;  %v878_v38 = vmax.f32 %v830_v25, -1e+30  ;;  %vm739_vm13 = vcmp.eq.s32.totalorder %v2678_v47, %v2662_v12 }
  0xf5   : > { %v551_v52 = vpop.f32.mrf.mxu1  ;;  %1067 = vmin.xlane.f32.xlu0 %v926_v44  ;;  %1049 = vmin.xlane.f32.xlu2 %v917_v45  ;;  %v596_v53 = vmul.f32 2.0, %v486_v48  ;;  %v647_v0 = vsub.f32 %v2656_v8, %v610_v56  ;;  %v871_v14 = vmax.f32 %v823_v60, -1e+30  ;;  %v919_v23 = vmin.f32 %v839_v63, 1e+30 }
  0xf6   : > { %v597_v57 = vmul.f32 2.0, %v551_v52  ;;  %v648_v1 = vsub.f32 %v2660_v11, %v611_v3 }
  0xf7   : > { %987 = vmax.xlane.f32.xlu1 %v870_v54  ;;  %v2748_v62 = vsub.f32 %v2656_v8, %v596_v53  ;;  %v778_v28 = vsel %vm746_vm0, %v647_v0, -1e+30  ;;  %v810_v39 = vsel %vm746_vm0, 1e+30, %v647_v0 }
  0xf8   : > { %v2745_v61 = vsub.f32 %v2660_v11, %v597_v57  ;;  %v779_v29 = vsel %vm747_vm1, %v648_v1, -1e+30  ;;  %v811_v43 = vsel %vm747_vm1, 1e+30, %v648_v1 }
  0xf9   : > { %v796_v20 = vsel %vm732_vm14, 1e+30, %v2748_v62  ;;  %v831_v6 = vmax.f32 %v778_v28, %v779_v29  ;;  %v847_v3 = vmin.f32 %v810_v39, %v811_v43 }
  0xfa   : > { %v510_v4 = vpop.f32.mrf.mxu2  ;;  %v797_v21 = vsel %vm733_vm15, 1e+30, %v2745_v61  ;;  %v765_v15 = vsel %vm733_vm15, %v2745_v61, -1e+30 }
  0xfb   : > { %v575_v10 = vpop.f32.mrf.mxu3  ;;  %v612_v16 = vmul.f32 2.0, %v510_v4  ;;  %v840_v30 = vmin.f32 %v796_v20, %v797_v21  ;;  %v879_v52 = vmax.f32 %v831_v6, -1e+30  ;;  %v718_v4 = vpop.permute.xlu2 %717 }
  0xfc   : > { %v613_v18 = vmul.f32 2.0, %v575_v10  ;;  %v489_v19 = vpop.f32.mrf.mxu0  ;;  %vm752_vm10 = vcmp.eq.s32.totalorder %v718_v4, %v2658_v9  ;;  %vm753_vm11 = vcmp.eq.s32.totalorder %v718_v4, %v2662_v12 }
  0xfd   : > { %v554_v22 = vpop.f32.mrf.mxu1  ;;  %1051 = vmin.xlane.f32.xlu2 %v918_v13  ;;  %989 = vmax.xlane.f32.xlu0 %v871_v14  ;;  %v598_v27 = vmul.f32 2.0, %v489_v19  ;;  %v2777_v32 = vsub.f32 %v2656_v8, %v612_v16  ;;  %v920_v42 = vmin.f32 %v840_v30, 1e+30  ;;  %v764_v14 = vsel %vm732_vm14, %v2748_v62, -1e+30 }
  0xfe   : > { %v599_v26 = vmul.f32 2.0, %v554_v22  ;;  %v2780_v33 = vsub.f32 %v2660_v11, %v613_v18  ;;  %v927_v19 = vmin.f32 %v847_v3, 1e+30 }
  0xff   : > { %1053 = vmin.xlane.f32.xlu1 %v919_v23  ;;  %v2792_v36 = vsub.f32 %v2656_v8, %v598_v27  ;;  %v780_v46 = vsel %vm748_vm4, %v2777_v32, -1e+30  ;;  %v824_v27 = vmax.f32 %v764_v14, %v765_v15 }
 0x100   : > { %v2789_v35 = vsub.f32 %v2660_v11, %v599_v26  ;;  %v781_v48 = vsel %vm749_vm5, %v2780_v33, -1e+30 }
 0x101   : > { %v766_v55 = vsel %vm734_vm2, %v2792_v36, -1e+30  ;;  %v832_v57 = vmax.f32 %v780_v46, %v781_v48  ;;  %v872_v48 = vmax.f32 %v824_v27, -1e+30 }
 0x102   : > { %v513_v37 = vpop.f32.mrf.mxu2  ;;  %v767_v56 = vsel %vm735_vm3, %v2789_v35, -1e+30 }
 0x103   : > { %v614_v40 = vmul.f32 2.0, %v513_v37  ;;  %v578_v41 = vpop.f32.mrf.mxu3  ;;  %v825_v5 = vmax.f32 %v766_v55, %v767_v56  ;;  %v880_v20 = vmax.f32 %v832_v57, -1e+30  ;;  %v813_v57 = vsel %vm749_vm5, 1e+30, %v2780_v33 }
 0x104   : > { %v615_v44 = vmul.f32 2.0, %v578_v41  ;;  %v492_v45 = vpop.f32.mrf.mxu0 }
 0x105   : > { %v651_v49 = vsub.f32 %v2656_v8, %v614_v40  ;;  %v557_v50 = vpop.f32.mrf.mxu1  ;;  %1003 = vmax.xlane.f32.xlu2 %v878_v38  ;;  %1055 = vmin.xlane.f32.xlu0 %v920_v42  ;;  %v600_v51 = vmul.f32 2.0, %v492_v45  ;;  %v873_v26 = vmax.f32 %v825_v5, -1e+30  ;;  %v721_v45 = vpop.permute.xlu0 %720 }
 0x106   : > { %v652_v53 = vsub.f32 %v2660_v11, %v615_v44  ;;  %v601_v54 = vmul.f32 2.0, %v557_v50  ;;  %vm754_vm14 = vcmp.eq.s32.totalorder %v721_v45, %v2658_v9  ;;  %vm755_vm15 = vcmp.eq.s32.totalorder %v721_v45, %v2662_v12 }
 0x107   : > { %1005 = vmax.xlane.f32.xlu1 %v879_v52  ;;  %v2822_v58 = vsel %vm750_vm6, 1e+30, %v651_v49  ;;  %v2826_v59 = vsel %vm750_vm6, %v651_v49, -1e+30  ;;  %v637_v63 = vsub.f32 %v2656_v8, %v600_v51  ;;  %v798_v49 = vsel %vm734_vm2, 1e+30, %v2792_v36 }
 0x108   : > { %v638_v60 = vsub.f32 %v2660_v11, %v601_v54  ;;  %v2832_v0 = vsel %vm751_vm7, 1e+30, %v652_v53  ;;  %v2836_v1 = vsel %vm751_vm7, %v652_v53, -1e+30  ;;  %v799_v53 = vsel %vm735_vm3, 1e+30, %v2789_v35 }
 0x109   : > { %v849_v17 = vmin.f32 %v2822_v58, %v2832_v0  ;;  %v833_v10 = vmax.f32 %v2826_v59, %v2836_v1  ;;  %v768_v62 = vsel %vm736_vm8, %v637_v63, -1e+30  ;;  %v800_v30 = vsel %vm736_vm8, 1e+30, %v637_v63  ;;  %v951_v58 = vld [vmem:[%s2922_s17] sm:$0xff] }
 0x10a   : > { %v516_v13 = vpop.f32.mrf.mxu2  ;;  %v769_v2 = vsel %vm737_vm9, %v638_v60, -1e+30  ;;  %v801_v34 = vsel %vm737_vm9, 1e+30, %v638_v60  ;;  %v812_v35 = vsel %vm748_vm4, 1e+30, %v2777_v32  ;;  %v841_v60 = vmin.f32 %v798_v49, %v799_v53 }
 0x10b   : > { %v616_v16 = vmul.f32 2.0, %v516_v13  ;;  %v581_v18 = vpop.f32.mrf.mxu3  ;;  %v826_v6 = vmax.f32 %v768_v62, %v769_v2  ;;  %v842_v43 = vmin.f32 %v800_v30, %v801_v34  ;;  %v848_v14 = vmin.f32 %v812_v35, %v813_v57  ;;  %v952_v30 = vld [vmem:[%s2922_s17 + $0x8] sm:$0xff] }
 0x10c   : > { %v617_v21 = vmul.f32 2.0, %v581_v18  ;;  %v495_v22 = vpop.f32.mrf.mxu0  ;;  %v881_v12 = vmax.f32 %v833_v10, -1e+30  ;;  %v960_v53 = vld [vmem:[%s2922_s17 + $0x48] sm:$0xff] }
 0x10d   : > { %v653_v61 = vsub.f32 %v2656_v8, %v616_v16  ;;  %v560_v23 = vpop.f32.mrf.mxu1  ;;  %1069 = vmin.xlane.f32.xlu2 %v927_v19  ;;  %1007 = vmax.xlane.f32.xlu0 %v880_v20  ;;  %v602_v25 = vmul.f32 2.0, %v495_v22  ;;  %v874_v52 = vmax.f32 %v826_v6, -1e+30  ;;  %v922_v3 = vmin.f32 %v842_v43, 1e+30 }
 0x10e   : > { %v654_v28 = vsub.f32 %v2660_v11, %v617_v21  ;;  %v603_v29 = vmul.f32 2.0, %v560_v23  ;;  %v921_v16 = vmin.f32 %v841_v60, 1e+30  ;;  %v928_v33 = vmin.f32 %v848_v14, 1e+30 }
 0x10f   : > { %993 = vmax.xlane.f32.xlu1 %v873_v26  ;;  %v784_v37 = vsel %vm752_vm10, %v653_v61, -1e+30  ;;  %v816_v38 = vsel %vm752_vm10, 1e+30, %v653_v61  ;;  %v639_v40 = vsub.f32 %v2656_v8, %v602_v25  ;;  %v929_v20 = vmin.f32 %v849_v17, 1e+30 }
 0x110   : > { %v640_v39 = vsub.f32 %v2660_v11, %v603_v29  ;;  %v785_v41 = vsel %vm753_vm11, %v654_v28, -1e+30  ;;  %v817_v42 = vsel %vm753_vm11, 1e+30, %v654_v28 }
 0x111   : > { %v834_v44 = vmax.f32 %v784_v37, %v785_v41  ;;  %v850_v24 = vmin.f32 %v816_v38, %v817_v42  ;;  %v802_v55 = vsel %vm738_vm12, 1e+30, %v639_v40  ;;  %v770_v32 = vsel %vm738_vm12, %v639_v40, -1e+30  ;;  %v959_v41 = vld [vmem:[%s2922_s17 + $0x40] sm:$0xff] }
 0x112   : > { %v519_v46 = vpop.f32.mrf.mxu2  ;;  %v803_v36 = vsel %vm739_vm13, 1e+30, %v640_v39  ;;  %v771_v31 = vsel %vm739_vm13, %v640_v39, -1e+30 }
 0x113   : > { %v618_v50 = vmul.f32 2.0, %v519_v46  ;;  %v584_v51 = vpop.f32.mrf.mxu3  ;;  %v827_v19 = vmax.f32 %v770_v32, %v771_v31  ;;  %v882_v22 = vmax.f32 %v834_v44, -1e+30  ;;  %v930_v62 = vmin.f32 %v850_v24, 1e+30 }
 0x114   : > { %v619_v54 = vmul.f32 2.0, %v584_v51 }
 0x115   : > { %v655_v56 = vsub.f32 %v2656_v8, %v618_v50  ;;  %991 = vmax.xlane.f32.xlu2 %v872_v48  ;;  %995 = vmax.xlane.f32.xlu0 %v874_v52  ;;  %v843_v8 = vmin.f32 %v802_v55, %v803_v36  ;;  %v875_v21 = vmax.f32 %v827_v19, -1e+30  ;;  %v953_v55 = vld [vmem:[%s2922_s17 + $0x10] sm:$0xff] }
 0x116   : > { %v656_v7 = vsub.f32 %v2660_v11, %v619_v54  ;;  %v2950_v19 = vld [vmem:[%s2922_s17 + $0x50] sm:$0xff] }
 0x117   : > { %1059 = vmin.xlane.f32.xlu1 %v922_v3  ;;  %v786_v63 = vsel %vm754_vm14, %v655_v56, -1e+30  ;;  %v818_v4 = vsel %vm754_vm14, 1e+30, %v655_v56  ;;  %v923_v18 = vmin.f32 %v843_v8, 1e+30 }
 0x118   : > { %v787_v5 = vsel %vm755_vm15, %v656_v7, -1e+30  ;;  %v819_v13 = vsel %vm755_vm15, 1e+30, %v656_v7 }
 0x119   : > { %v835_v15 = vmax.f32 %v786_v63, %v787_v5  ;;  %v851_v11 = vmin.f32 %v818_v4, %v819_v13 }
 0x11b   : > { %v883_v9 = vmax.f32 %v835_v15, -1e+30  ;;  %v931_v47 = vmin.f32 %v851_v11, 1e+30 }
 0x11d   : > { %1057 = vmin.xlane.f32.xlu2 %v921_v16  ;;  %1061 = vmin.xlane.f32.xlu0 %v923_v18 }
 0x11f   : > { %1071 = vmin.xlane.f32.xlu1 %v928_v33 }
 0x125   : > { %1073 = vmin.xlane.f32.xlu0 %v929_v20  ;;  %997 = vmax.xlane.f32.xlu2 %v875_v21 }
 0x127   : > { %1011 = vmax.xlane.f32.xlu1 %v882_v22 }
 0x12d   : > { %1013 = vmax.xlane.f32.xlu0 %v883_v9  ;;  %1009 = vmax.xlane.f32.xlu2 %v881_v12 }
 0x12f   : > { %1077 = vmin.xlane.f32.xlu1 %v931_v47 }
 0x135   : > { %1075 = vmin.xlane.f32.xlu2 %v930_v62 }
 0x152   : > { %v1048_v0 = vpop.xlane.xlu0 %1047  ;;  %v984_v17 = vpop.xlane.xlu1 %983 }
 0x153   : > { %v1079_v2 = vadd.f32 %v1048_v0, %v951_v58  ;;  %v1015_v61 = vadd.f32 %v984_v17, %v951_v58 }
 0x155   : > { %v1303_v59 = vmax.f32 %v1079_v2, 1e-12  ;;  %v1095_v1 = vmax.f32 %v1015_v61, 1e-12 }
 0x157   : > { %2165 = vrsqrt.f32 %v1303_v59  ;;  %vm1326_vm0 = vcmp.eq.f32.partialorder %v1303_v59, inf  ;;  %vm1118_vm1 = vcmp.eq.f32.partialorder %v1095_v1, inf  ;;  %v1329_v5 = vand.u32 2147483648, %v1303_v59 }
 0x158   : > { %2167 = vrsqrt.f32 %v1095_v1  ;;  %v1064_v10 = vpop.xlane.xlu2 %1063  ;;  %v1121_v14 = vand.u32 2147483648, %v1095_v1  ;;  %vm1328_vm2 = vcmp.eq.f32.partialorder %v1303_v59, 0.0  ;;  %vm1120_vm3 = vcmp.eq.f32.partialorder %v1095_v1, 0.0 }
 0x159   : > { %v1087_v46 = vadd.f32 %v1064_v10, %v959_v41 }
 0x15a   : > { %v1000_v23 = vpop.xlane.xlu1 %999 }
 0x15b   : > { %v1023_v51 = vadd.f32 %v1000_v23, %v959_v41  ;;  %v2930_v52 = vmax.f32 %v1087_v46, 1e-12 }
 0x15d   : > { %v2166_v25 = vpop.eup %2165  ;;  %v2936_v7 = vmax.f32 %v1023_v51, 1e-12  ;;  %vm1422_vm6 = vcmp.eq.f32.partialorder %v2930_v52, inf }
 0x15e   : > { %v2168_v26 = vpop.eup %2167  ;;  %v1320_v27 = vmul.f32 %v2166_v25, %v1303_v59 }
 0x15f   : > { %v1112_v28 = vmul.f32 %v2168_v26, %v1095_v1  ;;  %vm1214_vm7 = vcmp.eq.f32.partialorder %v2936_v7, inf }
 0x160   : > { %v1321_v29 = vmul.f32 %v2166_v25, %v1320_v27  ;;  %v986_v34 = vpop.xlane.xlu2 %985  ;;  %v1002_v44 = vpop.xlane.xlu0 %1001 }
 0x161   : > { %v1113_v6 = vmul.f32 %v2168_v26, %v1112_v28  ;;  %v1016_v39 = vadd.f32 %v986_v34, %v952_v30  ;;  %v1024_v35 = vadd.f32 %v1002_v44, %v960_v53 }
 0x162   : > { %v1322_v37 = vmul.f32 0.5, %v1321_v29  ;;  %v1066_v40 = vpop.xlane.xlu1 %1065 }
 0x163   : > { %v1114_v38 = vmul.f32 0.5, %v1113_v6  ;;  %v2927_v24 = vmax.f32 %v1016_v39, 1e-12  ;;  %v2943_v15 = vmax.f32 %v1024_v35, 1e-12  ;;  %v1088_v21 = vadd.f32 %v1066_v40, %v960_v53 }
 0x164   : > { %v1323_v42 = vsub.f32 1.5, %v1322_v37 }
 0x165   : > { %v1115_v43 = vsub.f32 1.5, %v1114_v38  ;;  %2169 = vrsqrt.f32 %v2927_v24  ;;  %v2968_v61 = vmax.f32 %v1088_v21, 1e-12  ;;  %vm1130_vm5 = vcmp.eq.f32.partialorder %v2927_v24, inf }
 0x166   : > { %v1324_v49 = vmul.f32 %v2166_v25, %v1323_v42  ;;  %v954_v25 = vld [vmem:[%s2922_s17 + $0x18] sm:$0xff]  ;;  %vm1132_vm9 = vcmp.eq.f32.partialorder %v2927_v24, 0.0 }
 0x167   : > { %v1116_v50 = vmul.f32 %v2168_v26, %v1115_v43 }
 0x168   : > { %v1050_v45 = vpop.xlane.xlu2 %1049  ;;  %v1325_v56 = vmul.f32 %v1324_v49, %v1303_v59  ;;  %v1068_v60 = vpop.xlane.xlu0 %1067 }
 0x169   : > { %v1080_v48 = vadd.f32 %v1050_v45, %v952_v30  ;;  %v1117_v3 = vmul.f32 %v1116_v50, %v1095_v1  ;;  %v1089_v58 = vadd.f32 %v1068_v60, %v2950_v19 }
 0x16a   : > { %v988_v36 = vpop.xlane.xlu1 %987  ;;  %v1327_v4 = vsel %vm1326_vm0, %v1303_v59, %v1325_v56 }
 0x16b   : > { %v2933_v54 = vmax.f32 %v1080_v48, 1e-12  ;;  %v2939_v57 = vpop.eup %2169  ;;  %v1017_v8 = vadd.f32 %v988_v36, %v953_v55  ;;  %v1119_v13 = vsel %vm1118_vm1, %v1095_v1, %v1117_v3  ;;  %v1330_v31 = vsel %vm1328_vm2, %v1329_v5, %v1327_v4  ;;  %v3002_v3 = vld [vmem:[%s2922_s17 + $0x20] sm:$0xff]  ;;  %v3277_v5 = vld [vmem:[%s2922_s17 + $0x70] sm:$0xff] }
 0x16c   : > { %v1124_v11 = vmul.f32 %v2939_v57, %v2927_v24  ;;  %v1122_v33 = vsel %vm1120_vm3, %v1121_v14, %v1119_v13  ;;  %v2974_v27 = vmax.f32 %v1089_v58, 1e-12 }
 0x16d   : > { %2171 = vrsqrt.f32 %v2933_v54  ;;  %v2947_v18 = vmax.f32 %v1017_v8, 1e-12  ;;  %v2961_v62 = vsub.f32 %v1330_v31, %v1122_v33  ;;  %vm1338_vm4 = vcmp.eq.f32.partialorder %v2933_v54, inf }
 0x16e   : > { %2173 = vrsqrt.f32 %v2930_v52  ;;  %v1125_v9 = vmul.f32 %v2939_v57, %v1124_v11  ;;  %vm1340_vm8 = vcmp.eq.f32.partialorder %v2933_v54, 0.0 }
 0x16f   : > { %2175 = vrsqrt.f32 %v2936_v7  ;;  %v1559_v26 = vand.u32 2147483647, %v2961_v62  ;;  %vm1142_vm10 = vcmp.eq.f32.partialorder %v2947_v18, inf  ;;  %vm1144_vm11 = vcmp.eq.f32.partialorder %v2947_v18, 0.0 }
 0x170   : > { %v1052_v63 = vpop.xlane.xlu2 %1051  ;;  %2177 = vrsqrt.f32 %v2943_v15  ;;  %v990_v1 = vpop.xlane.xlu0 %989  ;;  %v1126_v23 = vmul.f32 0.5, %v1125_v9  ;;  %v1341_v9 = vand.u32 2147483648, %v2933_v54 }
 0x171   : > { %v1081_v16 = vadd.f32 %v1052_v63, %v953_v55  ;;  %2179 = vrsqrt.f32 %v2947_v18  ;;  %v1018_v37 = vadd.f32 %v990_v1, %v954_v25  ;;  %v1575_v41 = vsub.f32 0.0, %v1559_v26 }
 0x172   : > { %v1054_v2 = vpop.xlane.xlu1 %1053  ;;  %v1127_v40 = vsub.f32 1.5, %v1126_v23 }
 0x173   : > { %v2172_v32 = vpop.eup %2171  ;;  %v2957_v12 = vmax.f32 %v1081_v16, 1e-12  ;;  %v1082_v28 = vadd.f32 %v1054_v2, %v954_v25  ;;  %v2994_v50 = vmax.f32 %v1018_v37, 1e-12  ;;  %v1591_v55 = vmul.f32 1.442695, %v1575_v41 }
 0x174   : > { %v2952_v20 = vpop.eup %2173  ;;  %v1332_v22 = vmul.f32 %v2172_v32, %v2933_v54  ;;  %v1128_v51 = vmul.f32 %v2939_v57, %v1127_v40 }
 0x175   : > { %v2959_v47 = vpop.eup %2175  ;;  %v1416_v17 = vmul.f32 %v2952_v20, %v2930_v52  ;;  %2181 = vrsqrt.f32 %v2957_v12  ;;  %v2988_v43 = vmax.f32 %v1082_v28, 1e-12  ;;  %vm1350_vm12 = vcmp.eq.f32.partialorder %v2957_v12, inf }
 0x176   : > { %v1333_v0 = vmul.f32 %v2172_v32, %v1332_v22  ;;  %v1208_v10 = vmul.f32 %v2959_v47, %v2936_v7  ;;  %v2976_v29 = vpop.eup %2177  ;;  %2183 = vrsqrt.f32 %v2968_v61  ;;  %v1129_v13 = vmul.f32 %v1128_v51, %v2927_v24 }
 0x177   : > { %v1417_v30 = vmul.f32 %v2952_v20, %v1416_v17  ;;  %v2979_v6 = vpop.eup %2179  ;;  %v1220_v42 = vmul.f32 %v2976_v29, %v2943_v15  ;;  %2185 = vrsqrt.f32 %v2974_v27  ;;  %vm1352_vm13 = vcmp.eq.f32.partialorder %v2957_v12, 0.0 }
 0x178   : > { %v1334_v59 = vmul.f32 0.5, %v1333_v0  ;;  %v1209_v39 = vmul.f32 %v2959_v47, %v1208_v10  ;;  %v1004_v44 = vpop.xlane.xlu2 %1003  ;;  %v1136_v48 = vmul.f32 %v2979_v6, %v2947_v18  ;;  %2187 = vrsqrt.f32 %v2988_v43  ;;  %v1056_v35 = vpop.xlane.xlu0 %1055 }
 0x179   : > { %v1418_v45 = vmul.f32 0.5, %v1417_v30  ;;  %v1221_v56 = vmul.f32 %v2976_v29, %v1220_v42  ;;  %2189 = vrsqrt.f32 %v2994_v50  ;;  %v1083_v11 = vadd.f32 %v1056_v35, %v3002_v3 }
 0x17a   : > { %v1335_v34 = vsub.f32 1.5, %v1334_v59  ;;  %v1210_v36 = vmul.f32 0.5, %v1209_v39  ;;  %v1137_v4 = vmul.f32 %v2979_v6, %v1136_v48  ;;  %2191 = vpow2.f32 %v1591_v55  ;;  %v3034_v10 = vpop.xlane.xlu1 %1005 }
 0x17b   : > { %v2982_v38 = vpop.eup %2181  ;;  %v1419_v60 = vsub.f32 1.5, %v1418_v45  ;;  %v1025_v17 = vadd.f32 %v1004_v44, %v2950_v19  ;;  %v3032_v1 = vmax.f32 %v1083_v11, 1e-12  ;;  %v1133_v19 = vand.u32 2147483648, %v2927_v24 }
 0x17c   : > { %v1336_v46 = vmul.f32 %v2172_v32, %v1335_v34  ;;  %v1344_v49 = vmul.f32 %v2982_v38, %v2957_v12  ;;  %v2997_v53 = vpop.eup %2183  ;;  %v1211_v16 = vsub.f32 1.5, %v1210_v36  ;;  %v1222_v32 = vmul.f32 0.5, %v1221_v56 }
 0x17d   : > { %v3005_v63 = vpop.eup %2185  ;;  %v1428_v14 = vmul.f32 %v2997_v53, %v2968_v61  ;;  %v1420_v31 = vmul.f32 %v2952_v20, %v1419_v60  ;;  %v1138_v58 = vmul.f32 0.5, %v1137_v4  ;;  %v1131_v20 = vsel %vm1130_vm5, %v2927_v24, %v1129_v13 }
 0x17e   : > { %v1337_v8 = vmul.f32 %v1336_v46, %v2933_v54  ;;  %v1345_v57 = vmul.f32 %v2982_v38, %v1344_v49  ;;  %v1440_v33 = vmul.f32 %v3005_v63, %v2974_v27  ;;  %v3021_v22 = vpop.eup %2187  ;;  %v1212_v25 = vmul.f32 %v2959_v47, %v1211_v16 }
 0x17f   : > { %v1429_v59 = vmul.f32 %v2997_v53, %v1428_v14  ;;  %v3036_v23 = vpop.eup %2189  ;;  %v1223_v26 = vsub.f32 1.5, %v1222_v32  ;;  %v1421_v30 = vmul.f32 %v1420_v31, %v2930_v52  ;;  %v1134_v39 = vsel %vm1132_vm9, %v1133_v19, %v1131_v20 }
 0x180   : > { %v1339_v21 = vsel %vm1338_vm4, %v2933_v54, %v1337_v8  ;;  %v1346_v0 = vmul.f32 0.5, %v1345_v57  ;;  %v3026_v2 = vpop.xlane.xlu2 %1069  ;;  %v1441_v34 = vmul.f32 %v3005_v63, %v1440_v33  ;;  %v1356_v54 = vmul.f32 %v3021_v22, %v2988_v43  ;;  %v3045_v37 = vpop.eup %2191 }
 0x181   : > { %v1342_v28 = vsel %vm1340_vm8, %v1341_v9, %v1339_v21  ;;  %v1139_v40 = vsub.f32 1.5, %v1138_v58  ;;  %v3047_v42 = vmax.f32 %v1025_v17, 1e-12  ;;  %v1430_v47 = vmul.f32 0.5, %v1429_v59  ;;  %v3054_v24 = vpop.xlane.xlu0 %1007  ;;  %v956_v17 = vld [vmem:[%s2922_s17 + $0x28] sm:$0xff] }
 0x182   : > { %v1347_v41 = vsub.f32 1.5, %v1346_v0  ;;  %v3049_v44 = vsub.f32 %v1342_v28, %v1134_v39  ;;  %v1148_v45 = vmul.f32 %v3036_v23, %v2994_v50  ;;  %2193 = vrsqrt.f32 %v3032_v1  ;;  %v994_v33 = vpop.xlane.xlu1 %993 }
 0x183   : > { %v1527_v46 = vsub.f32 0.0, %v2961_v62  ;;  %v1213_v48 = vmul.f32 %v1212_v25, %v2936_v7  ;;  %v1224_v51 = vmul.f32 %v2976_v29, %v1223_v26  ;;  %v1623_v55 = vadd.f32 1.0, %v3045_v37  ;;  %v962_v26 = vld [vmem:[%s2922_s17 + $0x58] sm:$0xff] }
 0x184   : > { %v1442_v56 = vmul.f32 0.5, %v1441_v34  ;;  %v1357_v35 = vmul.f32 %v3021_v22, %v1356_v54  ;;  %v1140_v8 = vmul.f32 %v2979_v6, %v1139_v40  ;;  %v1348_v4 = vmul.f32 %v2982_v38, %v1347_v41 }
 0x185   : > { %2195 = vrsqrt.f32 %v3047_v42  ;;  %v3070_v62 = vsel %vm1422_vm6, %v2930_v52, %v1421_v30  ;;  %v1431_v29 = vsub.f32 1.5, %v1430_v47  ;;  %v1560_v57 = vand.u32 2147483647, %v3049_v44 }
 0x186   : > { %v1149_v13 = vmul.f32 %v3036_v23, %v1148_v45  ;;  %v3074_v14 = vmax.f32 %v1527_v46, 0.0  ;;  %v3079_v6 = vsel %vm1214_vm7, %v2936_v7, %v1213_v48  ;;  %v3082_v38 = vmul.f32 %v1224_v51, %v2943_v15 }
 0x187   : > { %2197 = vlog2.f32 %v1623_v55  ;;  %v1443_v32 = vsub.f32 1.5, %v1442_v56  ;;  %v1358_v31 = vmul.f32 0.5, %v1357_v35  ;;  %v1626_v21 = vmul.f32 -0.5, %v3045_v37 }
 0x188   : > { %v992_v11 = vpop.xlane.xlu2 %991  ;;  %v3085_v16 = vpop.eup %2193  ;;  %v1141_v9 = vmul.f32 %v1140_v8, %v2947_v18  ;;  %v1145_v58 = vand.u32 2147483648, %v2947_v18  ;;  %v1349_v0 = vmul.f32 %v1348_v4, %v2957_v12  ;;  %v1432_v20 = vmul.f32 %v2997_v53, %v1431_v29 }
 0x189   : > { %v1576_v59 = vsub.f32 0.0, %v1560_v57  ;;  %v1150_v25 = vmul.f32 0.5, %v1149_v13  ;;  %v1019_v19 = vadd.f32 %v992_v11, %v3002_v3  ;;  %v1629_v30 = vand.u32 2147483647, %v3045_v37  ;;  %v996_v41 = vpop.xlane.xlu0 %995  ;;  %v3127_v13 = vld [vmem:[%s2922_s17 + $0x60] sm:$0xff] }
 0x18a   : > { %v1368_v34 = vmul.f32 %v3085_v16, %v3032_v1  ;;  %v1444_v54 = vmul.f32 %v3005_v63, %v1443_v32  ;;  %v1353_v53 = vand.u32 2147483648, %v2957_v12  ;;  %v1359_v39 = vsub.f32 1.5, %v1358_v31 }
 0x18b   : > { %v3096_v28 = vpop.eup %2195  ;;  %v1020_v40 = vadd.f32 %v994_v33, %v956_v17  ;;  %v1627_v3 = vadd.f32 1.0, %v1626_v21  ;;  %v1143_v47 = vsel %vm1142_vm10, %v2947_v18, %v1141_v9  ;;  %v1351_v45 = vsel %vm1350_vm12, %v2957_v12, %v1349_v0  ;;  %v957_v21 = vld [vmem:[%s2922_s17 + $0x30] sm:$0xff] }
 0x18c   : > { %v1026_v46 = vadd.f32 %v3034_v10, %v962_v26  ;;  %v1593_v51 = vmul.f32 1.442695, %v1576_v59  ;;  %v1151_v55 = vsub.f32 1.5, %v1150_v25  ;;  %v1232_v63 = vmul.f32 %v3096_v28, %v3047_v42 }
 0x18d   : > { %v2198_v48 = vpop.eup %2197  ;;  %v3112_v56 = vmax.f32 %v1019_v19, 1e-12  ;;  %vm3114_vm14 = vcmp.lt.f32.partialorder %v1629_v30, 0.0004427343  ;;  %v3119_v8 = vmul.f32 %v1432_v20, %v2968_v61  ;;  %v1369_v4 = vmul.f32 %v3085_v16, %v1368_v34  ;;  %v1060_v20 = vpop.xlane.xlu1 %1059 }
 0x18e   : > { %v1090_v10 = vadd.f32 %v3026_v2, %v962_v26  ;;  %v1354_v29 = vsel %vm1352_vm13, %v1353_v53, %v1351_v45  ;;  %v1360_v57 = vmul.f32 %v3021_v22, %v1359_v39  ;;  %v3129_v11 = vmax.f32 %v1020_v40, 1e-12 }
 0x18f   : > { %2199 = vrsqrt.f32 %v3112_v56  ;;  %v1625_v32 = vmul.f32 0.6931472, %v2198_v48  ;;  %v1628_v31 = vmul.f32 %v3045_v37, %v1627_v3  ;;  %v3134_v33 = vmul.f32 %v1444_v54, %v2974_v27 }
 0x190   : > { %v1146_v2 = vsel %vm1144_vm11, %v1145_v58, %v1143_v47  ;;  %v1058_v12 = vpop.xlane.xlu2 %1057  ;;  %2201 = vpow2.f32 %v1593_v51  ;;  %v1152_v22 = vmul.f32 %v3036_v23, %v1151_v55  ;;  %vm1154_vm15 = vcmp.eq.f32.partialorder %v2994_v50, inf }
 0x191   : > { %4008 = vst [vmem:[#allocation10_spill] sm:$0xff] %v3134_v33  ;;  %v1233_v9 = vmul.f32 %v3096_v28, %v1232_v63  ;;  %v3142_v0 = vmax.f32 %v1026_v46, 1e-12  ;;  %v3144_v59 = vsub.f32 %v1354_v29, %v1146_v2  ;;  %v1370_v37 = vmul.f32 0.5, %v1369_v4  ;;  %v1062_v39 = vpop.xlane.xlu0 %1061 }
 0x192   : > { %v3146_v25 = vmax.f32 %v1090_v10, 1e-12  ;;  %v1027_v18 = vadd.f32 %v3054_v24, %v3127_v13  ;;  %v1361_v58 = vmul.f32 %v1360_v57, %v2988_v43  ;;  %2203 = vrsqrt.f32 %v3129_v11 }
 0x193   : > { %v1021_v23 = vadd.f32 %v996_v41, %v957_v21  ;;  %v1084_v26 = vadd.f32 %v1058_v12, %v956_v17  ;;  %vm1156_vm0 = vcmp.eq.f32.partialorder %v2994_v50, 0.0  ;;  %v1157_v19 = vand.u32 2147483648, %v2994_v50  ;;  %v958_v17 = vld [vmem:[%s2922_s17 + $0x38] sm:$0xff] }
 0x194   : > { %vm1362_vm1 = vcmp.eq.f32.partialorder %v2988_v43, inf  ;;  %vm1364_vm2 = vcmp.eq.f32.partialorder %v2988_v43, 0.0  ;;  %v1085_v30 = vadd.f32 %v1060_v20, %v957_v21  ;;  %v1631_v24 = vsel %vm3114_vm14, %v1628_v31, %v1625_v32 }
 0x195   : > { %v3156_v34 = vpop.eup %2199  ;;  %v1153_v54 = vmul.f32 %v1152_v22, %v2994_v50  ;;  %v1234_v53 = vmul.f32 0.5, %v1233_v9  ;;  %2205 = vrsqrt.f32 %v3142_v0  ;;  %v3164_v40 = vmax.f32 %v1027_v18, 1e-12 }
 0x196   : > { %2207 = vrsqrt.f32 %v3146_v25  ;;  %v1160_v41 = vmul.f32 %v3156_v34, %v3112_v56  ;;  %v3168_v3 = vmax.f32 %v1084_v26, 1e-12  ;;  %v3170_v47 = vpop.eup %2201  ;;  %v1561_v45 = vand.u32 2147483647, %v3144_v59  ;;  %v1072_v26 = vpop.xlane.xlu1 %1071 }
 0x197   : > { %v1363_v46 = vsel %vm1362_vm1, %v2988_v43, %v1361_v58  ;;  %v1371_v48 = vsub.f32 1.5, %v1370_v37  ;;  %v3176_v51 = vmax.f32 %v1021_v23, 1e-12  ;;  %v3179_v63 = vmax.f32 %v1085_v30, 1e-12 }
 0x198   : > { %v1161_v55 = vmul.f32 %v3156_v34, %v1160_v41  ;;  %2209 = vrsqrt.f32 %v3168_v3  ;;  %v1086_v35 = vadd.f32 %v1062_v39, %v958_v17  ;;  %v3182_v4 = vpop.eup %2203  ;;  %v3185_v10 = vadd.f32 %v1631_v24, %v3074_v14  ;;  %v998_v12 = vpop.xlane.xlu2 %997 }
 0x199   : > { %v1528_v29 = vsub.f32 0.0, %v3049_v44  ;;  %v1365_v57 = vand.u32 2147483648, %v2988_v43  ;;  %v1377_v32 = vand.u32 2147483648, %v3032_v1  ;;  %v1632_v31 = vadd.f32 1.0, %v3170_v47 }
 0x19a   : > { %4009 = vst [vmem:[#allocation11_spill] sm:$0xff] %v3185_v10  ;;  %v1155_v2 = vsel %vm1154_vm15, %v2994_v50, %v1153_v54  ;;  %v1235_v21 = vsub.f32 1.5, %v1234_v53  ;;  %vm1374_vm3 = vcmp.eq.f32.partialorder %v3032_v1, inf  ;;  %2211 = vrsqrt.f32 %v3164_v40 }
 0x19b   : > { %v3196_v14 = vpop.eup %2205  ;;  %v1366_v44 = vsel %vm1364_vm2, %v1365_v57, %v1363_v46  ;;  %v1372_v22 = vmul.f32 %v3085_v16, %v1371_v48  ;;  %v1162_v9 = vmul.f32 0.5, %v1161_v55  ;;  %2213 = vrsqrt.f32 %v3176_v51 }
 0x19c   : > { %v3202_v20 = vpop.eup %2207  ;;  %v1577_v37 = vsub.f32 0.0, %v1561_v45  ;;  %v1172_v18 = vmul.f32 %v3182_v4, %v3129_v11  ;;  %2215 = vrsqrt.f32 %v3179_v63  ;;  %v3207_v58 = vmax.f32 %v1086_v35, 1e-12 }
 0x19d   : > { %v3209_v23 = vmax.f32 %v1528_v29, 0.0  ;;  %v1635_v43 = vmul.f32 -0.5, %v3170_v47  ;;  %v1158_v16 = vsel %vm1156_vm0, %v1157_v19, %v1155_v2  ;;  %vm1376_vm4 = vcmp.eq.f32.partialorder %v3032_v1, 0.0 }
 0x19e   : > { %v1022_v30 = vadd.f32 %v998_v12, %v958_v17  ;;  %v3215_v24 = vpop.eup %2209  ;;  %2217 = vlog2.f32 %v1632_v31  ;;  %v1529_v54 = vsub.f32 0.0, %v3144_v59  ;;  %v1514_v53 = vsub.f32 %v1366_v44, %v1158_v16  ;;  %v3234_v31 = vpop.xlane.xlu0 %1073 }
 0x19f   : > { %v1244_v39 = vmul.f32 %v3196_v14, %v3142_v0  ;;  %v1373_v41 = vmul.f32 %v1372_v22, %v3032_v1  ;;  %v1452_v45 = vmul.f32 %v3202_v20, %v3146_v25  ;;  %v1163_v50 = vsub.f32 1.5, %v1162_v9  ;;  %v1012_v36 = vpop.xlane.xlu1 %1011 }
 0x1a0   : > { %v1380_v19 = vmul.f32 %v3215_v24, %v3168_v3  ;;  %v3225_v46 = vpop.eup %2211  ;;  %v1595_v17 = vmul.f32 1.442695, %v1577_v37  ;;  %v1236_v48 = vmul.f32 %v3096_v28, %v1235_v21  ;;  %v1173_v59 = vmul.f32 %v3182_v4, %v1172_v18 }
 0x1a1   : > { %2219 = vrsqrt.f32 %v3207_v58  ;;  %v3230_v55 = vpop.eup %2213  ;;  %v1636_v35 = vadd.f32 1.0, %v1635_v43  ;;  %v1638_v29 = vand.u32 2147483647, %v3170_v47  ;;  %v3236_v2 = vmax.f32 %v1022_v30, 1e-12 }
 0x1a2   : > { %v1381_v57 = vmul.f32 %v3215_v24, %v1380_v19  ;;  %v3238_v12 = vpop.eup %2215  ;;  %v3240_v44 = vmax.f32 %v1529_v54, 0.0  ;;  %v1530_v28 = vsub.f32 0.0, %v1514_v53  ;;  %v1562_v21 = vand.u32 2147483647, %v1514_v53 }
 0x1a3   : > { %v1245_v22 = vmul.f32 %v3196_v14, %v1244_v39  ;;  %v1375_v9 = vsel %vm1374_vm3, %v3032_v1, %v1373_v41  ;;  %v1453_v37 = vmul.f32 %v3202_v20, %v1452_v45  ;;  %v1256_v18 = vmul.f32 %v3225_v46, %v3164_v40 }
 0x1a4   : > { %4010 = vst [vmem:[#allocation12_spill] sm:$0xff] %v3240_v44  ;;  %v1164_v43 = vmul.f32 %v3156_v34, %v1163_v50  ;;  %v2218_v16 = vpop.eup %2217  ;;  %2221 = vpow2.f32 %v1595_v17  ;;  %v3251_v30 = vmul.f32 %v1236_v48, %v3047_v42  ;;  %v1174_v54 = vmul.f32 0.5, %v1173_v59  ;;  %v1010_v59 = vpop.xlane.xlu2 %1009 }
 0x1a5   : > { %v1382_v53 = vmul.f32 0.5, %v1381_v57  ;;  %v3254_v39 = vmul.f32 %v3170_v47, %v1636_v35  ;;  %v1184_v41 = vmul.f32 %v3230_v55, %v3176_v51  ;;  %v1392_v45 = vmul.f32 %v3238_v12, %v3179_v63 }
 0x1a6   : > { %2223 = vrsqrt.f32 %v3236_v2  ;;  %vm3263_vm5 = vcmp.lt.f32.partialorder %v1638_v29, 0.0004427343  ;;  %v3267_v19 = vmax.f32 %v1530_v28, 0.0  ;;  %v1578_v17 = vsub.f32 0.0, %v1562_v21 }
 0x1a7   : > { %v3261_v34 = vpop.eup %2219  ;;  %v1378_v47 = vsel %vm1376_vm4, %v1377_v32, %v1375_v9  ;;  %v1246_v48 = vmul.f32 0.5, %v1245_v22  ;;  %v1454_v35 = vmul.f32 0.5, %v1453_v37  ;;  %v1257_v57 = vmul.f32 %v3225_v46, %v1256_v18 }
 0x1a8   : > { %4013 = vst [vmem:[#allocation13_spill] sm:$0xff] %v3267_v19  ;;  %v1165_v60 = vmul.f32 %v1164_v43, %v3112_v56  ;;  %v1091_v29 = vadd.f32 %v1072_v26, %v3127_v13  ;;  %v1634_v28 = vmul.f32 0.6931472, %v2218_v16  ;;  %v1175_v49 = vsub.f32 1.5, %v1174_v54  ;;  %v964_v19 = vld [vmem:[%s2922_s17 + $0x68] sm:$0xff] }
 0x1a9   : > { %v1383_v10 = vsub.f32 1.5, %v1382_v53  ;;  %v1185_v1 = vmul.f32 %v3230_v55, %v1184_v41  ;;  %v1393_v32 = vmul.f32 %v3238_v12, %v1392_v45  ;;  %v1404_v22 = vmul.f32 %v3261_v34, %v3207_v58  ;;  %v966_v45 = vld [vmem:[%s2922_s17 + $0x78] sm:$0xff]  ;;  %s2339_s17 = scalar_lea.hbm %s2338_s16, 8 }
 0x1aa   : > { %v1028_v9 = vadd.f32 %v1010_v59, %v964_v19  ;;  %v3285_v37 = vpop.eup %2221  ;;  %v1597_v13 = vmul.f32 1.442695, %v1578_v17  ;;  %v1247_v26 = vsub.f32 1.5, %v1246_v48  ;;  %vm1166_vm6 = vcmp.eq.f32.partialorder %v3112_v56, inf  ;;  %v1014_v59 = vpop.xlane.xlu0 %1013  ;;  %p2340_p1 = scmp.ne.s32.totalorder %s2338_s16, %s2339_s17  ;;  %p2345_p6 = scmp.lt.s32.totalorder %s2343_s20, %s2339_s17 }
 0x1ab   : > { %4014 = vst [vmem:[#allocation14_spill] sm:$0xff] %v3285_v37  ;;  %v1029_v18 = vadd.f32 %v1012_v36, %v3277_v5  ;;  %v1455_v16 = vsub.f32 1.5, %v1454_v35  ;;  %v3291_v54 = vmul.f32 0.5, %v1257_v57  ;;  %vm1178_vm7 = vcmp.eq.f32.partialorder %v3129_v11, inf }
 0x1ac   : > { %v3289_v43 = vpop.eup %2223  ;;  %v1167_v53 = vsel %vm1166_vm6, %v3112_v56, %v1165_v60  ;;  %v3295_v41 = vmax.f32 %v1091_v29, 1e-12  ;;  %v1176_v17 = vmul.f32 %v3182_v4, %v1175_v49  ;;  %vm1168_vm8 = vcmp.eq.f32.partialorder %v3112_v56, 0.0  ;;  %p2341_p2 = pnand %p2340_p1, %p2484_p4  ;;  %p2346_p7 = por %p2345_p6, %p2344_p5 }
 0x1ad   : > { %v1169_v48 = vand.u32 2147483648, %v3112_v56  ;;  %v1384_v36 = vmul.f32 %v3215_v24, %v1383_v10  ;;  %v1186_v21 = vmul.f32 0.5, %v1185_v1  ;;  %v1394_v35 = vmul.f32 0.5, %v1393_v32 }
 0x1ae   : > { %v1405_v57 = vmul.f32 %v3261_v34, %v1404_v22  ;;  %v3303_v44 = vmax.f32 %v1028_v9, 1e-12  ;;  %v1196_v60 = vmul.f32 %v3289_v43, %v3236_v2  ;;  %v3307_v29 = vmax.f32 %v1029_v18, 1e-12  ;;  %p2342_p3 = pneg %p2341_p2 }
 0x1af   : > { %v1170_v37 = vsel %vm1168_vm8, %v1169_v48, %v1167_v53  ;;  %v1030_v33 = vadd.f32 %v1014_v59, %v966_v45  ;;  %v1640_v49 = vsel %vm3263_vm5, %v3254_v39, %v1634_v28  ;;  %v1248_v56 = vmul.f32 %v3196_v14, %v1247_v26 }
 0x1b0   : > { %vm1180_vm9 = vcmp.eq.f32.partialorder %v3129_v11, 0.0  ;;  %2225 = vrsqrt.f32 %v3295_v41  ;;  %v1092_v4 = vadd.f32 %v3234_v31, %v964_v19  ;;  %v1456_v10 = vmul.f32 %v3202_v20, %v1455_v16  ;;  %v1076_v31 = vpop.xlane.xlu2 %1075  ;;  %p2347_p9 = pnand %p2346_p7, %p2342_p3 }
 0x1b1   : > { %2227 = vpow2.f32 %v1597_v13  ;;  %v1177_v24 = vmul.f32 %v1176_v17, %v3129_v11  ;;  %v1385_v1 = vmul.f32 %v1384_v36, %v3168_v3  ;;  %v3319_v32 = vsub.f32 %v1378_v47, %v1170_v37 }
 0x1b2   : > { %v1187_v22 = vsub.f32 1.5, %v1186_v21  ;;  %v1406_v50 = vmul.f32 0.5, %v1405_v57  ;;  %2229 = vrsqrt.f32 %v3303_v44  ;;  %v1395_v14 = vsub.f32 1.5, %v1394_v35 }
 0x1b3   : > { %v1197_v39 = vmul.f32 %v3289_v43, %v1196_v60  ;;  %2231 = vrsqrt.f32 %v3307_v29  ;;  %v3324_v28 = vmax.f32 %v1030_v33, 1e-12  ;;  %v3327_v20 = vadd.f32 %v1640_v49, %v3209_v23  ;;  %v1078_v23 = vpop.xlane.xlu1 %1077 }
 0x1b4   : > { %v3330_v19 = vmul.f32 %v1248_v56, %v3142_v0  ;;  %vm1386_vm10 = vcmp.eq.f32.partialorder %v3168_v3, inf  ;;  %v3333_v47 = vmax.f32 %v1092_v4, 1e-12  ;;  %v3336_v21 = vmul.f32 %v1456_v10, %v3146_v25 }
 0x1b5   : > { %v1179_v9 = vsel %vm1178_vm7, %v3129_v11, %v1177_v24  ;;  %v1387_v33 = vsel %vm1386_vm10, %v3168_v3, %v1385_v1  ;;  %v1389_v37 = vand.u32 2147483648, %v3168_v3  ;;  %v1563_v26 = vand.u32 2147483647, %v3319_v32 }
 0x1b6   : > { %v3343_v13 = vpop.eup %2225  ;;  %v1188_v18 = vmul.f32 %v3230_v55, %v1187_v22  ;;  %v1407_v16 = vsub.f32 1.5, %v1406_v50  ;;  %v1093_v53 = vadd.f32 %v1076_v31, %v3277_v5  ;;  %v1396_v17 = vmul.f32 %v3238_v12, %v1395_v14 }
 0x1b7   : > { %v3348_v59 = vpop.eup %2227  ;;  %vm1388_vm11 = vcmp.eq.f32.partialorder %v3168_v3, 0.0  ;;  %v1198_v48 = vmul.f32 0.5, %v1197_v39  ;;  %2233 = vrsqrt.f32 %v3324_v28  ;;  %vm1190_vm12 = vcmp.eq.f32.partialorder %v3176_v51, inf }
 0x1b8   : > { %v3353_v36 = vpop.eup %2229  ;;  %v1390_v35 = vsel %vm1388_vm11, %v1389_v37, %v1387_v33  ;;  %2235 = vrsqrt.f32 %v3333_v47  ;;  %v1094_v55 = vadd.f32 %v1078_v23, %v966_v45  ;;  %v4015_v5 = vand.u32 2147483648, %v3129_v11 }
 0x1b9   : > { %v3357_v57 = vpop.eup %2231  ;;  %vm1192_vm13 = vcmp.eq.f32.partialorder %v3176_v51, 0.0  ;;  %v1193_v3 = vand.u32 2147483648, %v3176_v51  ;;  %v1464_v60 = vmul.f32 %v3343_v13, %v3295_v41  ;;  %vm1226_vm14 = vcmp.eq.f32.partialorder %v2943_v15, inf }
 0x1ba   : > { %v1182_v12 = vsel %vm1180_vm9, %v4015_v5, %v1179_v9  ;;  %v1579_v49 = vsub.f32 0.0, %v1563_v26  ;;  %v1189_v56 = vmul.f32 %v1188_v18, %v3176_v51  ;;  %v1408_v45 = vmul.f32 %v3261_v34, %v1407_v16 }
 0x1bb   : > { %v3370_v4 = vmax.f32 %v1093_v53, 1e-12  ;;  %vm1216_vm15 = vcmp.eq.f32.partialorder %v2936_v7, 0.0  ;;  %v1397_v11 = vmul.f32 %v1396_v17, %v3179_v63  ;;  %v3374_v10 = vsub.f32 %v1390_v35, %v1182_v12 }
 0x1bc   : > { %v1199_v24 = vsub.f32 1.5, %v1198_v48  ;;  %v1268_v1 = vmul.f32 %v3353_v36, %v3303_v44  ;;  %vm1398_vm0 = vcmp.eq.f32.partialorder %v3179_v63, inf  ;;  %vm1400_vm1 = vcmp.eq.f32.partialorder %v3179_v63, 0.0 }
 0x1bd   : > { %v1280_v22 = vmul.f32 %v3357_v57, %v3307_v29  ;;  %v3382_v34 = vmax.f32 %v1094_v55, 1e-12  ;;  %v3384_v50 = vpop.eup %2233  ;;  %v1401_v14 = vand.u32 2147483648, %v3179_v63  ;;  %vm1410_vm2 = vcmp.eq.f32.partialorder %v3207_v58, inf }
 0x1be   : > { %v1413_v39 = vand.u32 2147483648, %v3207_v58  ;;  %v1465_v31 = vmul.f32 %v3343_v13, %v1464_v60  ;;  %v3390_v9 = vpop.eup %2235  ;;  %v1599_v33 = vmul.f32 1.442695, %v1579_v49  ;;  %v1191_v37 = vsel %vm1190_vm12, %v3176_v51, %v1189_v56 }
 0x1bf   : > { %v1409_v23 = vmul.f32 %v1408_v45, %v3207_v58  ;;  %vm1202_vm3 = vcmp.eq.f32.partialorder %v3236_v2, inf  ;;  %2237 = vrsqrt.f32 %v3370_v4  ;;  %v1399_v26 = vsel %vm1398_vm0, %v3179_v63, %v1397_v11 }
 0x1c0   : > { %v1564_v18 = vand.u32 2147483647, %v3374_v10  ;;  %v1200_v16 = vmul.f32 %v3289_v43, %v1199_v24  ;;  %v1269_v53 = vmul.f32 %v3353_v36, %v1268_v1  ;;  %2239 = vrsqrt.f32 %v3382_v34 }
 0x1c1   : > { %v1259_v17 = vsub.f32 1.5, %v3291_v54  ;;  %v1281_v48 = vmul.f32 %v3357_v57, %v1280_v22  ;;  %v1292_v35 = vmul.f32 %v3384_v50, %v3324_v28  ;;  %v3409_v55 = vsel %vm1192_vm13, %v1193_v3, %v1191_v37 }
 0x1c2   : > { %v1476_v5 = vmul.f32 %v3390_v9, %v3333_v47  ;;  %vm1204_vm4 = vcmp.eq.f32.partialorder %v3236_v2, 0.0  ;;  %v1205_v43 = vand.u32 2147483648, %v3236_v2  ;;  %2241 = vpow2.f32 %v1599_v33 }
 0x1c3   : > { %v3417_v54 = vsel %vm1400_vm1, %v1401_v14, %v1399_v26  ;;  %v3422_v12 = vsel %vm1410_vm2, %v3207_v58, %v1409_v23  ;;  %v3424_v51 = vmul.f32 0.5, %v1465_v31  ;;  %v1580_v3 = vsub.f32 0.0, %v1564_v18 }
 0x1c4   : > { %v1201_v60 = vmul.f32 %v1200_v16, %v3236_v2  ;;  %v1227_v49 = vsel %vm1226_vm14, %v2943_v15, %v3082_v38  ;;  %v1270_v56 = vmul.f32 0.5, %v1269_v53  ;;  %v4016_v63 = vand.u32 2147483648, %v2936_v7 }
 0x1c5   : > { %v3431_v45 = vpop.eup %2237  ;;  %v1260_v24 = vmul.f32 %v3225_v46, %v1259_v17  ;;  %v1282_v1 = vmul.f32 0.5, %v1281_v48  ;;  %v1293_v22 = vmul.f32 %v3384_v50, %v1292_v35  ;;  %vm1228_vm5 = vcmp.eq.f32.partialorder %v2943_v15, 0.0 }
 0x1c6   : > { %v3438_v11 = vsel %vm1216_vm15, %v4016_v63, %v3079_v6  ;;  %vm1238_vm6 = vcmp.eq.f32.partialorder %v3047_v42, inf  ;;  %vm1240_vm7 = vcmp.eq.f32.partialorder %v3047_v42, 0.0  ;;  %vm1250_vm8 = vcmp.eq.f32.partialorder %v3142_v0, inf  ;;  %v3446_v38 = vpop.eup %2239 }
 0x1c7   : > { %v4017_v14 = vand.u32 2147483648, %v2943_v15  ;;  %v1239_v6 = vsel %vm1238_vm6, %v3047_v42, %v3251_v30  ;;  %v1241_v46 = vand.u32 2147483648, %v3047_v42  ;;  %v1251_v31 = vsel %vm1250_vm8, %v3142_v0, %v3330_v19 }
 0x1c8   : > { %v1601_v33 = vmul.f32 1.442695, %v1580_v3  ;;  %vm1412_vm9 = vcmp.eq.f32.partialorder %v3207_v58, 0.0  ;;  %v1203_v37 = vsel %vm1202_vm3, %v3236_v2, %v1201_v60  ;;  %v1488_v15 = vmul.f32 %v3431_v45, %v3370_v4  ;;  %v3463_v26 = vpop.eup %2241 }
 0x1c9   : > { %v3450_v7 = vsel %vm1228_vm5, %v4017_v14, %v1227_v49  ;;  %v1271_v23 = vsub.f32 1.5, %v1270_v56  ;;  %v1253_v30 = vand.u32 2147483648, %v3142_v0  ;;  %v1261_v18 = vmul.f32 %v1260_v24, %v3164_v40 }
 0x1ca   : > { %v1283_v16 = vsub.f32 1.5, %v1282_v1  ;;  %v1294_v53 = vmul.f32 0.5, %v1293_v22  ;;  %vm1424_vm10 = vcmp.eq.f32.partialorder %v2930_v52, 0.0  ;;  %vm1434_vm11 = vcmp.eq.f32.partialorder %v2968_v61, inf }
 0x1cb   : > { %v3471_v19 = vsel %vm1240_vm7, %v1241_v46, %v1239_v6  ;;  %vm1252_vm12 = vcmp.eq.f32.partialorder %v3142_v0, 0.0  ;;  %v1477_v17 = vmul.f32 %v3390_v9, %v1476_v5  ;;  %v1500_v48 = vmul.f32 %v3446_v38, %v3382_v34 }
 0x1cc   : > { %v3479_v35 = vsel %vm1204_vm4, %v1205_v43, %v1203_v37  ;;  %v3481_v3 = vsel %vm1252_vm12, %v1253_v30, %v1251_v31  ;;  %vm1262_vm13 = vcmp.eq.f32.partialorder %v3164_v40, inf  ;;  %vm1264_vm14 = vcmp.eq.f32.partialorder %v3164_v40, 0.0 }
 0x1cd   : > { %2243 = vpow2.f32 %v1601_v33  ;;  %v1265_v42 = vand.u32 2147483648, %v3164_v40  ;;  %v1272_v0 = vmul.f32 %v3353_v36, %v1271_v23  ;;  %v1489_v5 = vmul.f32 %v3431_v45, %v1488_v15 }
 0x1ce   : > { %v1263_v60 = vsel %vm1262_vm13, %v3164_v40, %v1261_v18  ;;  %vm1274_vm15 = vcmp.eq.f32.partialorder %v3303_v44, inf  ;;  %v1284_v2 = vmul.f32 %v3357_v57, %v1283_v16  ;;  %v1295_v43 = vsub.f32 1.5, %v1294_v53 }
 0x1cf   : > { %vm1276_vm0 = vcmp.eq.f32.partialorder %v3303_v44, 0.0  ;;  %v1467_v49 = vsub.f32 1.5, %v3424_v51  ;;  %v1478_v56 = vmul.f32 0.5, %v1477_v17  ;;  %v1501_v63 = vmul.f32 %v3446_v38, %v1500_v48 }
 0x1d0   : > { %v1277_v24 = vand.u32 2147483648, %v3303_v44  ;;  %vm1286_vm1 = vcmp.eq.f32.partialorder %v3307_v29, inf  ;;  %vm1288_vm2 = vcmp.eq.f32.partialorder %v3307_v29, 0.0  ;;  %v1289_v36 = vand.u32 2147483648, %v3307_v29 }
 0x1d1   : > { %v3500_v1 = vsel %vm1264_vm14, %v1265_v42, %v1263_v60  ;;  %v1273_v57 = vmul.f32 %v1272_v0, %v3303_v44  ;;  %vm1298_vm3 = vcmp.eq.f32.partialorder %v3324_v28, inf  ;;  %v1490_v51 = vmul.f32 0.5, %v1489_v5 }
 0x1d2   : > { %v1285_v22 = vmul.f32 %v1284_v2, %v3307_v29  ;;  %v1296_v14 = vmul.f32 %v3384_v50, %v1295_v43  ;;  %v1301_v6 = vand.u32 2147483648, %v3324_v28  ;;  %v1414_v46 = vsel %vm1412_vm9, %v1413_v39, %v3422_v12  ;;  %v4019_v39 = vld [vmem:[#allocation10_spill] sm:$0xff] }
 0x1d3   : > { %v3512_v40 = vpop.eup %2243  ;;  %vm1446_vm4 = vcmp.eq.f32.partialorder %v2974_v27, inf  ;;  %v1468_v31 = vmul.f32 %v3343_v13, %v1467_v49  ;;  %v1479_v33 = vsub.f32 1.5, %v1478_v56  ;;  %v1502_v37 = vmul.f32 0.5, %v1501_v63 }
 0x1d4   : > { %vm1300_vm5 = vcmp.eq.f32.partialorder %v3324_v28, 0.0  ;;  %v4018_v50 = vand.u32 2147483648, %v2930_v52  ;;  %v1435_v58 = vsel %vm1434_vm11, %v2968_v61, %v3119_v8  ;;  %vm1436_vm6 = vcmp.eq.f32.partialorder %v2968_v61, 0.0 }
 0x1d5   : > { %v1447_v13 = vsel %vm1446_vm4, %v2974_v27, %v4019_v39  ;;  %v1275_v12 = vsel %vm1274_vm15, %v3303_v44, %v1273_v57  ;;  %vm1448_vm7 = vcmp.eq.f32.partialorder %v2974_v27, 0.0  ;;  %vm1458_vm8 = vcmp.eq.f32.partialorder %v3146_v25, inf }
 0x1d6   : > { %v1426_v15 = vsel %vm1424_vm10, %v4018_v50, %v3070_v62  ;;  %v1491_v52 = vsub.f32 1.5, %v1490_v51  ;;  %v1287_v62 = vsel %vm1286_vm1, %v3307_v29, %v1285_v22  ;;  %v1297_v8 = vmul.f32 %v1296_v14, %v3324_v28 }
 0x1d7   : > { %v1449_v23 = vand.u32 2147483648, %v2974_v27  ;;  %v1459_v30 = vsel %vm1458_vm8, %v3146_v25, %v3336_v21  ;;  %v1461_v18 = vand.u32 2147483648, %v3146_v25  ;;  %v1469_v16 = vmul.f32 %v1468_v31, %v3295_v41 }
 0x1d8   : > { %v1480_v53 = vmul.f32 %v3390_v9, %v1479_v33  ;;  %v1503_v17 = vsub.f32 1.5, %v1502_v37  ;;  %v1278_v48 = vsel %vm1276_vm0, %v1277_v24, %v1275_v12  ;;  %v4020_v42 = vand.u32 2147483648, %v2968_v61 }
 0x1d9   : > { %v1450_v5 = vsel %vm1448_vm7, %v1449_v23, %v1447_v13  ;;  %vm1460_vm9 = vcmp.eq.f32.partialorder %v3146_v25, 0.0  ;;  %v1290_v27 = vsel %vm1288_vm2, %v1289_v36, %v1287_v62  ;;  %vm1470_vm10 = vcmp.eq.f32.partialorder %v3295_v41, inf }
 0x1da   : > { %v1438_v0 = vsel %vm1436_vm6, %v4020_v42, %v1435_v58  ;;  %v1462_v21 = vsel %vm1460_vm9, %v1461_v18, %v1459_v30  ;;  %v1492_v60 = vmul.f32 %v3431_v45, %v1491_v52  ;;  %v1299_v9 = vsel %vm1298_vm3, %v3324_v28, %v1297_v8 }
 0x1db   : > { %vm1472_vm11 = vcmp.eq.f32.partialorder %v3295_v41, 0.0  ;;  %v1473_v61 = vand.u32 2147483648, %v3295_v41  ;;  %vm1482_vm12 = vcmp.eq.f32.partialorder %v3333_v47, inf  ;;  %v1471_v25 = vsel %vm1470_vm10, %v3295_v41, %v1469_v16 }
 0x1dc   : > { %v1481_v44 = vmul.f32 %v1480_v53, %v3333_v47  ;;  %v1504_v29 = vmul.f32 %v3446_v38, %v1503_v17  ;;  %v1517_v2 = vsub.f32 %v3417_v54, %v3409_v55  ;;  %vm1484_vm13 = vcmp.eq.f32.partialorder %v3333_v47, 0.0 }
 0x1dd   : > { %v1485_v45 = vand.u32 2147483648, %v3333_v47  ;;  %vm1494_vm14 = vcmp.eq.f32.partialorder %v3370_v4, inf  ;;  %v1518_v43 = vsub.f32 %v1414_v46, %v3479_v35  ;;  %v1302_v49 = vsel %vm1300_vm5, %v1301_v6, %v1299_v9 }
 0x1de   : > { %v1493_v41 = vmul.f32 %v1492_v60, %v3370_v4  ;;  %vm1496_vm15 = vcmp.eq.f32.partialorder %v3370_v4, 0.0  ;;  %v1497_v38 = vand.u32 2147483648, %v3370_v4  ;;  %v1474_v56 = vsel %vm1472_vm11, %v1473_v61, %v1471_v25 }
 0x1df   : > { %vm1506_vm0 = vcmp.eq.f32.partialorder %v3382_v34, inf  ;;  %vm1508_vm1 = vcmp.eq.f32.partialorder %v3382_v34, 0.0  ;;  %v1519_v55 = vsub.f32 %v1426_v15, %v3438_v11  ;;  %v1483_v54 = vsel %vm1482_vm12, %v3333_v47, %v1481_v44 }
 0x1e0   : > { %v1505_v28 = vmul.f32 %v1504_v29, %v3382_v34  ;;  %v1520_v35 = vsub.f32 %v1438_v0, %v3450_v7  ;;  %v1565_v63 = vand.u32 2147483647, %v1517_v2  ;;  %v1509_v24 = vand.u32 2147483648, %v3382_v34 }
 0x1e1   : > { %v1521_v36 = vsub.f32 %v1450_v5, %v3471_v19  ;;  %v1522_v57 = vsub.f32 %v1462_v21, %v3481_v3  ;;  %v1566_v51 = vand.u32 2147483647, %v1518_v43  ;;  %v1495_v11 = vsel %vm1494_vm14, %v3370_v4, %v1493_v41 }
 0x1e2   : > { %v1523_v22 = vsub.f32 %v1474_v56, %v3500_v1  ;;  %v1531_v14 = vsub.f32 0.0, %v3319_v32  ;;  %v1532_v6 = vsub.f32 0.0, %v3374_v10  ;;  %v1486_v7 = vsel %vm1484_vm13, %v1485_v45, %v1483_v54  ;;  %v4022_v54 = vld [vmem:[#allocation14_spill] sm:$0xff] }
 0x1e3   : > { %v1533_v46 = vsub.f32 0.0, %v1517_v2  ;;  %v1534_v31 = vsub.f32 0.0, %v1518_v43  ;;  %v1567_v33 = vand.u32 2147483647, %v1519_v55  ;;  %v1507_v19 = vsel %vm1506_vm0, %v3382_v34, %v1505_v28 }
 0x1e4   : > { %v1524_v3 = vsub.f32 %v1486_v7, %v1278_v48  ;;  %v1568_v37 = vand.u32 2147483647, %v1520_v35  ;;  %v1581_v50 = vsub.f32 0.0, %v1565_v63  ;;  %v1498_v1 = vsel %vm1496_vm15, %v1497_v38, %v1495_v11 }
 0x1e5   : > { %v1535_v15 = vsub.f32 0.0, %v1519_v55  ;;  %v1569_v32 = vand.u32 2147483647, %v1521_v36  ;;  %v1582_v58 = vsub.f32 0.0, %v1566_v51  ;;  %v1536_v10 = vsub.f32 0.0, %v1520_v35 }
 0x1e6   : > { %v1537_v39 = vsub.f32 0.0, %v1521_v36  ;;  %v1538_v47 = vsub.f32 0.0, %v1522_v57  ;;  %v1570_v13 = vand.u32 2147483647, %v1522_v57  ;;  %v1510_v12 = vsel %vm1508_vm1, %v1509_v24, %v1507_v19 }
 0x1e7   : > { %v1539_v52 = vsub.f32 0.0, %v1523_v22  ;;  %v1571_v62 = vand.u32 2147483647, %v1523_v22  ;;  %v1583_v8 = vsub.f32 0.0, %v1567_v33  ;;  %v1525_v23 = vsub.f32 %v1498_v1, %v1290_v27 }
 0x1e8   : > { %v1572_v30 = vand.u32 2147483647, %v1524_v3  ;;  %v1584_v18 = vsub.f32 0.0, %v1568_v37  ;;  %v1603_v16 = vmul.f32 1.442695, %v1581_v50  ;;  %v3599_v53 = vmax.f32 %v1531_v14, 0.0 }
 0x1e9   : > { %v3601_v4 = vmax.f32 %v1532_v6, 0.0  ;;  %v1585_v17 = vsub.f32 0.0, %v1569_v32  ;;  %v1605_v48 = vmul.f32 1.442695, %v1582_v58  ;;  %v3603_v42 = vsub.f32 %v1510_v12, %v1302_v49 }
 0x1ea   : > { %v1540_v0 = vsub.f32 0.0, %v1524_v3  ;;  %v3605_v5 = vmax.f32 %v1533_v46, 0.0  ;;  %v1586_v34 = vsub.f32 0.0, %v1570_v13  ;;  %v3607_v21 = vmax.f32 %v1534_v31, 0.0 }
 0x1eb   : > { %4021 = vst [vmem:[#allocation10_spill] sm:$0xff] %v3603_v42  ;;  %v3609_v60 = vmax.f32 %v1535_v15, 0.0  ;;  %v1587_v27 = vsub.f32 0.0, %v1571_v62  ;;  %v1607_v9 = vmul.f32 1.442695, %v1583_v8  ;;  %v1541_v61 = vsub.f32 0.0, %v1525_v23 }
 0x1ec   : > { %v1588_v25 = vsub.f32 0.0, %v1572_v30  ;;  %2245 = vpow2.f32 %v1603_v16  ;;  %v1609_v44 = vmul.f32 1.442695, %v1584_v18  ;;  %v3611_v29 = vmax.f32 %v1536_v10, 0.0 }
 0x1ed   : > { %v1573_v2 = vand.u32 2147483647, %v1525_v23  ;;  %2247 = vpow2.f32 %v1605_v48  ;;  %v1611_v45 = vmul.f32 1.442695, %v1585_v17  ;;  %v3613_v43 = vmax.f32 %v1537_v39, 0.0 }
 0x1ee   : > { %v3615_v49 = vmax.f32 %v1538_v47, 0.0  ;;  %v1574_v41 = vand.u32 2147483647, %v3603_v42  ;;  %v1613_v38 = vmul.f32 1.442695, %v1586_v34  ;;  %v3618_v56 = vmax.f32 %v1539_v52, 0.0 }
 0x1ef   : > { %2249 = vpow2.f32 %v1607_v9  ;;  %v1615_v55 = vmul.f32 1.442695, %v1587_v27  ;;  %v1644_v28 = vmul.f32 -0.5, %v4022_v54  ;;  %v3621_v35 = vmax.f32 %v1540_v0, 0.0 }
 0x1f0   : > { %2251 = vpow2.f32 %v1609_v44  ;;  %v1617_v63 = vmul.f32 1.442695, %v1588_v25  ;;  %v1653_v24 = vmul.f32 -0.5, %v3348_v59  ;;  %v3624_v36 = vmax.f32 %v1541_v61, 0.0 }
 0x1f1   : > { %v1589_v57 = vsub.f32 0.0, %v1573_v2  ;;  %2253 = vpow2.f32 %v1611_v45  ;;  %v1641_v51 = vadd.f32 1.0, %v4022_v54  ;;  %v1590_v22 = vsub.f32 0.0, %v1574_v41 }
 0x1f2   : > { %4023 = vst [vmem:[#allocation14_spill] sm:$0xff] %v3624_v36  ;;  %v3627_v11 = vpop.eup %2245  ;;  %2255 = vpow2.f32 %v1613_v38  ;;  %v1650_v14 = vadd.f32 1.0, %v3348_v59  ;;  %v1783_v6 = vlaneseq  ;;  %v1645_v31 = vadd.f32 1.0, %v1644_v28 }
 0x1f3   : > { %v3630_v7 = vpop.eup %2247  ;;  %2257 = vpow2.f32 %v1615_v55  ;;  %v1659_v33 = vadd.f32 1.0, %v3463_v26  ;;  %v1654_v19 = vadd.f32 1.0, %v1653_v24  ;;  %v1662_v3 = vmul.f32 -0.5, %v3463_v26 }
 0x1f4   : > { %2259 = vpow2.f32 %v1617_v63  ;;  %v1668_v37 = vadd.f32 1.0, %v3512_v40  ;;  %v1619_v1 = vmul.f32 1.442695, %v1589_v57  ;;  %v1671_v15 = vmul.f32 -0.5, %v3512_v40 }
 0x1f5   : > { %v3636_v50 = vpop.eup %2249  ;;  %2261 = vlog2.f32 %v1641_v51  ;;  %v1677_v32 = vadd.f32 1.0, %v3627_v11  ;;  %v1621_v10 = vmul.f32 1.442695, %v1590_v22  ;;  %v1647_v39 = vand.u32 2147483647, %v4022_v54 }
 0x1f6   : > { %v3640_v58 = vpop.eup %2251  ;;  %2263 = vlog2.f32 %v1650_v14  ;;  %v1686_v47 = vadd.f32 1.0, %v3630_v7  ;;  %v3647_v12 = vmul.f32 %v4022_v54, %v1645_v31  ;;  %v1656_v52 = vand.u32 2147483647, %v3348_v59 }
 0x1f7   : > { %v3644_v13 = vpop.eup %2253  ;;  %2265 = vlog2.f32 %v1659_v33  ;;  %v1665_v62 = vand.u32 2147483647, %v3463_v26  ;;  %v3654_v23 = vmul.f32 %v3348_v59, %v1654_v19  ;;  %v1663_v30 = vadd.f32 1.0, %v1662_v3 }
 0x1f8   : > { %v3651_v8 = vpop.eup %2255  ;;  %2267 = vlog2.f32 %v1668_v37  ;;  %v1674_v18 = vand.u32 2147483647, %v3512_v40  ;;  %v1672_v17 = vadd.f32 1.0, %v1671_v15  ;;  %v1680_v48 = vmul.f32 -0.5, %v3627_v11 }
 0x1f9   : > { %v3657_v16 = vpop.eup %2257  ;;  %2269 = vlog2.f32 %v1677_v32  ;;  %v1695_v0 = vadd.f32 1.0, %v3636_v50  ;;  %v1683_v27 = vand.u32 2147483647, %v3627_v11  ;;  %v1689_v59 = vmul.f32 -0.5, %v3630_v7 }
 0x1fa   : > { %v3661_v34 = vpop.eup %2259  ;;  %2271 = vlog2.f32 %v1686_v47  ;;  %v1704_v9 = vadd.f32 1.0, %v3640_v58  ;;  %vm3666_vm2 = vcmp.lt.f32.partialorder %v1647_v39, 0.0004427343  ;;  %vm3670_vm3 = vcmp.lt.f32.partialorder %v1656_v52, 0.0004427343 }
 0x1fb   : > { %v2262_v61 = vpop.eup %2261  ;;  %2273 = vpow2.f32 %v1619_v1  ;;  %v1692_v2 = vand.u32 2147483647, %v3630_v7  ;;  %v1698_v45 = vmul.f32 -0.5, %v3636_v50  ;;  %v1713_v41 = vadd.f32 1.0, %v3644_v13 }
 0x1fc   : > { %v2264_v38 = vpop.eup %2263  ;;  %2275 = vpow2.f32 %v1621_v10  ;;  %v3678_v55 = vmul.f32 %v3463_v26, %v1663_v30  ;;  %vm3680_vm4 = vcmp.lt.f32.partialorder %v1665_v62, 0.0004427343  ;;  %v1707_v28 = vmul.f32 -0.5, %v3640_v58 }
 0x1fd   : > { %v2266_v63 = vpop.eup %2265  ;;  %v3686_v24 = vmul.f32 %v3512_v40, %v1672_v17  ;;  %vm3688_vm5 = vcmp.lt.f32.partialorder %v1674_v18, 0.0004427343  ;;  %v1681_v51 = vadd.f32 1.0, %v1680_v48  ;;  %2277 = vlog2.f32 %v1695_v0 }
 0x1fe   : > { %v1716_v22 = vmul.f32 -0.5, %v3644_v13  ;;  %v2268_v26 = vpop.eup %2267  ;;  %vm3693_vm6 = vcmp.lt.f32.partialorder %v1683_v27, 0.0004427343  ;;  %v1690_v31 = vadd.f32 1.0, %v1689_v59  ;;  %v1701_v33 = vand.u32 2147483647, %v3636_v50 }
 0x1ff   : > { %2279 = vlog2.f32 %v1704_v9  ;;  %v1722_v40 = vadd.f32 1.0, %v3651_v8  ;;  %v2270_v19 = vpop.eup %2269  ;;  %vm3699_vm7 = vcmp.lt.f32.partialorder %v1692_v2, 0.0004427343  ;;  %v1699_v37 = vadd.f32 1.0, %v1698_v45 }
 0x200   : > { %v1710_v1 = vand.u32 2147483647, %v3640_v58  ;;  %2281 = vlog2.f32 %v1713_v41  ;;  %v2272_v15 = vpop.eup %2271  ;;  %v3704_v32 = vmul.f32 0.6931472, %v2262_v61  ;;  %v3706_v10 = vmul.f32 0.6931472, %v2264_v38 }
 0x201   : > { %v1708_v39 = vadd.f32 1.0, %v1707_v28  ;;  %v1725_v47 = vmul.f32 -0.5, %v3651_v8  ;;  %v3709_v52 = vpop.eup %2273  ;;  %v3711_v62 = vmul.f32 0.6931472, %v2266_v63  ;;  %v3714_v30 = vmul.f32 %v3627_v11, %v1681_v51 }
 0x202   : > { %v1717_v18 = vadd.f32 1.0, %v1716_v22  ;;  %v1719_v17 = vand.u32 2147483647, %v3644_v13  ;;  %v3717_v48 = vpop.eup %2275  ;;  %v3719_v0 = vmul.f32 0.6931472, %v2268_v26  ;;  %v3722_v27 = vmul.f32 %v3630_v7, %v1690_v31 }
 0x203   : > { %vm3724_vm8 = vcmp.lt.f32.partialorder %v1701_v33, 0.0004427343  ;;  %2283 = vlog2.f32 %v1722_v40  ;;  %v2278_v9 = vpop.eup %2277  ;;  %v3728_v61 = vmul.f32 0.6931472, %v2270_v19  ;;  %v3730_v11 = vmul.f32 0.6931472, %v2272_v15 }
 0x204   : > { %v3733_v2 = vmul.f32 %v3636_v50, %v1699_v37  ;;  %vm3735_vm9 = vcmp.lt.f32.partialorder %v1710_v1, 0.0004427343  ;;  %v1649_v41 = vsel %vm3666_vm2, %v3647_v12, %v3704_v32  ;;  %v1658_v38 = vsel %vm3670_vm3, %v3654_v23, %v3706_v10 }
 0x205   : > { %v2280_v7 = vpop.eup %2279  ;;  %v3748_v28 = vmul.f32 %v3640_v58, %v1708_v39  ;;  %v1726_v50 = vadd.f32 1.0, %v1725_v47  ;;  %v1667_v51 = vsel %vm3680_vm4, %v3678_v55, %v3711_v62  ;;  %v3755_v22 = vmul.f32 %v3644_v13, %v1717_v18 }
 0x206   : > { %v2282_v63 = vpop.eup %2281  ;;  %vm3757_vm10 = vcmp.lt.f32.partialorder %v1719_v17, 0.0004427343  ;;  %v1734_v25 = vmul.f32 -0.5, %v3657_v16  ;;  %v3767_v23 = vmul.f32 0.6931472, %v2278_v9  ;;  %v3771_v55 = vshrl.u32 %v1783_v6, 7 }
 0x207   : > { %v1728_v44 = vand.u32 2147483647, %v3651_v8  ;;  %v3781_v26 = vmul.f32 0.6931472, %v2280_v7  ;;  %v1731_v31 = vadd.f32 1.0, %v3657_v16  ;;  %v3787_v6 = vmul.f32 %v3651_v8, %v1726_v50 }
 0x208   : > { %v3784_v40 = vmul.f32 0.6931472, %v2282_v63  ;;  %v1785_v19 = vadd.s32 8, %v3771_v55  ;;  %v1786_v37 = vadd.s32 16, %v3771_v55  ;;  %v1735_v1 = vadd.f32 1.0, %v1734_v25 }
 0x209   : > { %v2284_v33 = vpop.eup %2283  ;;  %v1740_v15 = vadd.f32 1.0, %v3661_v34  ;;  %v1743_v32 = vmul.f32 -0.5, %v3661_v34  ;;  %v3793_v10 = vstv %s2056_s27  ;;  %vm3799_vm11 = vcmp.lt.f32.partialorder %v1728_v44, 0.0004427343 }
 0x20a   : > { %v1749_v8 = vadd.f32 1.0, %v3709_v52  ;;  %v1787_v62 = vadd.s32 24, %v3771_v55  ;;  %v3809_v17 = vmul.f32 0.6931472, %v2284_v33  ;;  %2285 = vlog2.f32 %v1731_v31 }
 0x20b   : > { %v1737_v9 = vand.u32 2147483647, %v3657_v16  ;;  %v1788_v7 = vadd.s32 32, %v3771_v55  ;;  %v1801_v50 = vadd.s32 %v3793_v10, %v3771_v55  ;;  %v1802_v63 = vadd.s32 %v3793_v10, %v1785_v19 }
 0x20c   : > { %v1803_v25 = vadd.s32 %v3793_v10, %v1786_v37  ;;  %v3822_v33 = vmul.f32 %v3657_v16, %v1735_v1  ;;  %2287 = vlog2.f32 %v1740_v15  ;;  %v1744_v31 = vadd.f32 1.0, %v1743_v32  ;;  %v4044_v16 = vld [vmem:[#allocation12_spill] sm:$0xff] }
 0x20d   : > { %v1746_v46 = vand.u32 2147483647, %v3661_v34  ;;  %2289 = vlog2.f32 %v1749_v8  ;;  %v1789_v18 = vadd.s32 40, %v3771_v55  ;;  %v1804_v39 = vadd.s32 %v3793_v10, %v1787_v62  ;;  %v4045_v62 = vld [vmem:[#allocation13_spill] sm:$0xff] }
 0x20e   : > { %v1752_v37 = vmul.f32 -0.5, %v3709_v52  ;;  %v1755_v44 = vand.u32 2147483647, %v3709_v52  ;;  %v1769_v1 = vadd.f32 %v1649_v41, %v4044_v16  ;;  %v1805_v15 = vadd.s32 %v3793_v10, %v1788_v7 }
 0x20f   : > { %vm1817_vm12 = vcmp.lt.s32.totalorder %v1801_v50, 8  ;;  %vm1818_vm13 = vcmp.lt.s32.totalorder %v1802_v63, 8  ;;  %vm1819_vm14 = vcmp.lt.s32.totalorder %v1803_v25, 8  ;;  %v3836_v8 = vmul.f32 %v3661_v34, %v1744_v31  ;;  %v4048_v34 = vld [vmem:[#allocation11_spill] sm:$0xff] }
 0x210   : > { %v2286_v32 = vpop.eup %2285  ;;  %v1770_v54 = vadd.f32 %v1658_v38, %v4045_v62  ;;  %v1790_v13 = vadd.s32 48, %v3771_v55  ;;  %v1791_v19 = vadd.s32 56, %v3771_v55  ;;  %vm3841_vm15 = vcmp.lt.f32.partialorder %v1737_v9, 0.0004427343 }
 0x211   : > { %v1758_v41 = vadd.f32 1.0, %v3717_v48  ;;  %v1771_v7 = vadd.f32 %v1667_v51, %v3599_v53  ;;  %v1806_v50 = vadd.s32 %v3793_v10, %v1789_v18  ;;  %vm1820_vm0 = vcmp.lt.s32.totalorder %v1804_v39, 8 }
 0x212   : > { %v2288_v63 = vpop.eup %2287  ;;  %v1833_v25 = vsel %vm1817_vm12, %v4048_v34, 0.0  ;;  %v1834_v38 = vsel %vm1818_vm13, %v3327_v20, 0.0  ;;  %v1835_v31 = vsel %vm1819_vm14, %v1769_v1, 0.0  ;;  %vm1849_vm1 = vcmask 7168  }
 0x213   : > { %v2290_v16 = vpop.eup %2289  ;;  %v1753_v62 = vadd.f32 1.0, %v1752_v37  ;;  %v1761_v9 = vmul.f32 -0.5, %v3717_v48  ;;  %v4049_v53 = vsel %vm3688_vm5, %v3686_v24, %v3719_v0  ;;  %vm1821_vm2 = vcmp.lt.s32.totalorder %v1805_v15, 8 }
 0x214   : > { %v1772_v51 = vadd.f32 %v4049_v53, %v3601_v4  ;;  %v1792_v39 = vadd.s32 64, %v3771_v55  ;;  %v1807_v18 = vadd.s32 %v3793_v10, %v1790_v13  ;;  %v1808_v20 = vadd.s32 %v3793_v10, %v1791_v19 }
 0x215   : > { %v1836_v1 = vsel %vm1820_vm0, %v1770_v54, 0.0  ;;  %vm1822_vm3 = vcmp.lt.s32.totalorder %v1806_v50, 8  ;;  %v1850_v37 = vsel %vm1849_vm1, %v1833_v25, 0.0  ;;  %v1851_v34 = vsel %vm1849_vm1, %v1834_v38, 0.0 }
 0x216   : > { %v1853_v42 = vsel %vm1849_vm1, %v1835_v31, 0.0  ;;  %v1733_v57 = vmul.f32 0.6931472, %v2286_v32  ;;  %v1764_v36 = vand.u32 2147483647, %v3717_v48  ;;  %v1837_v24 = vsel %vm1821_vm2, %v1771_v7, 0.0 }
 0x217   : > { %v1852_v4 = vadd.f32 %v1851_v34, %v1850_v37  ;;  %2291 = vlog2.f32 %v1758_v41  ;;  %v4050_v0 = vsel %vm3693_vm6, %v3714_v30, %v3728_v61  ;;  %v1793_v54 = vadd.s32 72, %v3771_v55 }
 0x218   : > { %v1773_v13 = vadd.f32 %v4050_v0, %v3605_v5  ;;  %v1855_v19 = vsel %vm1849_vm1, %v1836_v1, 0.0  ;;  %vm3872_vm4 = vcmp.lt.f32.partialorder %v1746_v46, 0.0004427343  ;;  %vm3876_vm5 = vcmp.lt.f32.partialorder %v1755_v44, 0.0004427343 }
 0x219   : > { %v4055_v14 = vsel %vm3699_vm7, %v3722_v27, %v3730_v11  ;;  %v1794_v5 = vadd.s32 80, %v3771_v55  ;;  %v1838_v61 = vsel %vm1822_vm3, %v1772_v51, 0.0  ;;  %v1854_v41 = vadd.f32 %v1853_v42, %v1852_v4 }
 0x21a   : > { %v1774_v30 = vadd.f32 %v4055_v14, %v3607_v21  ;;  %v1809_v46 = vadd.s32 %v3793_v10, %v1792_v39  ;;  %vm1823_vm6 = vcmp.lt.s32.totalorder %v1807_v18, 8  ;;  %vm1824_vm12 = vcmp.lt.s32.totalorder %v1808_v20, 8  ;;  %v4063_v14 = vld [vmem:[#allocation10_spill] sm:$0xff] }
 0x21b   : > { %v1857_v44 = vsel %vm1849_vm1, %v1837_v24, 0.0  ;;  %v1739_v7 = vsel %vm3841_vm15, %v3822_v33, %v1733_v57  ;;  %v1754_v3 = vmul.f32 %v3709_v52, %v1753_v62  ;;  %v1762_v25 = vadd.f32 1.0, %v1761_v9 }
 0x21c   : > { %v1856_v27 = vadd.f32 %v1855_v19, %v1854_v41  ;;  %v1742_v21 = vmul.f32 0.6931472, %v2288_v63  ;;  %v1795_v11 = vadd.s32 88, %v3771_v55  ;;  %v1810_v50 = vadd.s32 %v3793_v10, %v1793_v54  ;;  %v4062_v19 = vld [vmem:[#allocation14_spill] sm:$0xff] }
 0x21d   : > { %v1859_v42 = vsel %vm1849_vm1, %v1838_v61, 0.0  ;;  %v4056_v38 = vsel %vm3724_vm8, %v3733_v2, %v3767_v23  ;;  %v1839_v58 = vsel %vm1823_vm6, %v1773_v13, 0.0  ;;  %v1840_v33 = vsel %vm1824_vm12, %v1774_v30, 0.0  ;;  %v2292_v52 = vpop.eup %2291 }
 0x21e   : > { %v1775_v31 = vadd.f32 %v4056_v38, %v3609_v60  ;;  %v1858_v53 = vadd.f32 %v1857_v44, %v1856_v27  ;;  %v1751_v62 = vmul.f32 0.6931472, %v2290_v16  ;;  %v1796_v63 = vadd.s32 96, %v3771_v55 }
 0x21f   : > { %v1811_v9 = vadd.s32 %v3793_v10, %v1794_v5  ;;  %vm1825_vm7 = vcmp.lt.s32.totalorder %v1809_v46, 8  ;;  %v4057_v59 = vsel %vm3735_vm9, %v3748_v28, %v3781_v26  ;;  %v1797_v2 = vadd.s32 104, %v3771_v55 }
 0x220   : > { %v1776_v51 = vadd.f32 %v4057_v59, %v3611_v29  ;;  %v1798_v60 = vadd.s32 112, %v3771_v55  ;;  %v1860_v23 = vadd.f32 %v1859_v42, %v1858_v53  ;;  %v1812_v39 = vadd.s32 %v3793_v10, %v1795_v11 }
 0x221   : > { %vm1826_vm8 = vcmp.lt.s32.totalorder %v1810_v50, 8  ;;  %v1861_v16 = vsel %vm1849_vm1, %v1839_v58, 0.0  ;;  %v1863_v18 = vsel %vm1849_vm1, %v1840_v33, 0.0  ;;  %v4058_v45 = vsel %vm3757_vm10, %v3755_v22, %v3784_v40 }
 0x222   : > { %v1777_v28 = vadd.f32 %v4058_v45, %v3613_v43  ;;  %v4059_v29 = vsel %vm3799_vm11, %v3787_v6, %v3809_v17  ;;  %v1841_v20 = vsel %vm1825_vm7, %v1775_v31, 0.0  ;;  %v1862_v1 = vadd.f32 %v1861_v16, %v1860_v23 }
 0x223   : > { %v1778_v26 = vadd.f32 %v4059_v29, %v3615_v49  ;;  %v1748_v37 = vsel %vm3872_vm4, %v3836_v8, %v1742_v21  ;;  %v1757_v12 = vsel %vm3876_vm5, %v1754_v3, %v1751_v62  ;;  %v1813_v34 = vadd.s32 %v3793_v10, %v1796_v63 }
 0x224   : > { %vm1827_vm9 = vcmp.lt.s32.totalorder %v1811_v9, 8  ;;  %v1760_v43 = vmul.f32 0.6931472, %v2292_v52  ;;  %v1799_v22 = vadd.s32 120, %v3771_v55  ;;  %v1842_v40 = vsel %vm1826_vm8, %v1776_v51, 0.0 }
 0x225   : > { %v1864_v47 = vadd.f32 %v1863_v18, %v1862_v1  ;;  %v1814_v6 = vadd.s32 %v3793_v10, %v1797_v2  ;;  %v1815_v49 = vadd.s32 %v3793_v10, %v1798_v60  ;;  %vm1828_vm10 = vcmp.lt.s32.totalorder %v1812_v39, 8 }
 0x226   : > { %v1865_v17 = vsel %vm1849_vm1, %v1841_v20, 0.0  ;;  %v1763_v8 = vmul.f32 %v3717_v48, %v1762_v25  ;;  %v1779_v57 = vadd.f32 %v1739_v7, %v3618_v56  ;;  %v1843_v24 = vsel %vm1827_vm9, %v1777_v28, 0.0 }
 0x227   : > { %v1866_v4 = vadd.f32 %v1865_v17, %v1864_v47  ;;  %vm3940_vm11 = vcmp.lt.f32.partialorder %v1764_v36, 0.0004427343  ;;  %v1780_v55 = vadd.f32 %v1748_v37, %v3621_v35  ;;  %vm1829_vm13 = vcmp.lt.s32.totalorder %v1813_v34, 8 }
 0x228   : > { %v1867_v13 = vsel %vm1849_vm1, %v1842_v40, 0.0  ;;  %v1766_v54 = vsel %vm3940_vm11, %v1763_v8, %v1760_v43  ;;  %v1781_v15 = vadd.f32 %v1757_v12, %v4062_v19  ;;  %v1844_v32 = vsel %vm1828_vm10, %v1778_v26, 0.0 }
 0x229   : > { %v1868_v48 = vadd.f32 %v1867_v13, %v1866_v4  ;;  %v1816_v56 = vadd.s32 %v3793_v10, %v1799_v22  ;;  %vm1830_vm14 = vcmp.lt.s32.totalorder %v1814_v6, 8  ;;  %vm1831_vm15 = vcmp.lt.s32.totalorder %v1815_v49, 8 }
 0x22a   : > { %v1869_v36 = vsel %vm1849_vm1, %v1843_v24, 0.0  ;;  %v4064_v30 = vsub.f32 0.0, %v4063_v14  ;;  %v1845_v35 = vsel %vm1829_vm13, %v1779_v57, 0.0  ;;  %v1871_v41 = vsel %vm1849_vm1, %v1844_v32, 0.0 }
 0x22b   : > { %v1870_v61 = vadd.f32 %v1869_v36, %v1868_v48  ;;  %v1846_v44 = vsel %vm1830_vm14, %v1780_v55, 0.0  ;;  %v1847_v7 = vsel %vm1831_vm15, %v1781_v15, 0.0  ;;  %vm1832_vm0 = vcmp.lt.s32.totalorder %v1816_v56, 8 }
 0x22c   : > { %v1558_v5 = vmax.f32 %v4064_v30, 0.0  ;;  %v1873_v25 = vsel %vm1849_vm1, %v1845_v35, 0.0  ;;  %v1875_v10 = vsel %vm1849_vm1, %v1846_v44, 0.0  ;;  %v1877_v21 = vsel %vm1849_vm1, %v1847_v7, 0.0 }
 0x22d   : > { %v1872_v3 = vadd.f32 %v1871_v41, %v1870_v61 }
 0x22e   : > { %v1782_v46 = vadd.f32 %v1766_v54, %v1558_v5 }
 0x22f   : > { %v1874_v27 = vadd.f32 %v1873_v25, %v1872_v3 }
 0x230   : > { %v1848_v11 = vsel %vm1832_vm0, %v1782_v46, 0.0 }
 0x231   : > { %v1876_v50 = vadd.f32 %v1875_v10, %v1874_v27  ;;  %v1879_v38 = vsel %vm1849_vm1, %v1848_v11, 0.0 }
 0x233   : > { %v1878_v42 = vadd.f32 %v1877_v21, %v1876_v50 }
 0x235   : > { %v1880_v31 = vadd.f32 %v1879_v38, %v1878_v42 }
 0x237   : > { %1881 = vadd.xlane.f32.xlu2 %v1880_v31 }
 0x2aa   : > { %v1882_v58 = vpop.xlane.xlu2 %1881 }
 0x2ab   : > { %v1883_v33 = vrot.slane %v1882_v58, 4 }
 0x2ad   : > { %v1884_v53 = vadd.f32 %v1883_v33, %v1882_v58 }
 0x2af   : > { %v1885_v52 = vrot.slane %v1884_v53, 2 }
 0x2b1   : > { %v1886_v62 = vadd.f32 %v1885_v52, %v1884_v53 }
 0x2b3   : > { %v1887_v63 = vrot.slane %v1886_v62, 1 }
 0x2b5   : > { %v1888_v9 = vadd.f32 %v1887_v63, %v1886_v62 }
 0x2b7   : > { %2093 = vpush %v1888_v9 }
 0x2e8   : > { %s2094_s13 = spop %2093 }
 0x2e9   : > { %v1890_v59 = vstv %s2094_s13 }
 0x2ea   : > { %1891 = vst [vmem:[%s341_s11] sm:$0xff] %v1890_v59 }
 0x2eb   : > { %2350 = shalt.err (!%p2347_p9)
}
 0x2ec   : > { %2099 = dma.vmem_to_hbm [thread:$0]  (%p2484_p4), %s1906_s12, 128, %s1908_s14, %s1893_s15  }
 0x2ed PF: > { %p2111_p10 = scmp.ge.s32.totalorder %s2405_s26, 2  ;;  %s1919_s18 = sand.u32 1, %s2385_s21  }
 0x2ee   : > { %s1920_s30 = scalar_lea.sflag [#allocation6], %s1919_s18 }
 0x2ef   : > { %p2106_p11 = pnand %p2111_p10, %p2491_p8 }
 0x2f1   : > { %p2107_p12 = pneg %p2106_p11 }
 0x2f3   : > { %2380 = dma.done.wait (%p2107_p12), %s1920_s30, 128  }
 0x2f4   : > { %2382 = vsyncadd (%p2107_p12), %s1920_s30, 4294967168  ;;  %s20_s26 = sadd.s32 1, %s2405_s26   ;;  %s4065_s21 = smov %s2389_s22 }
 0x2f5   : > { %p17_p13 = scmp.ge.s32.totalorder %s20_s26, 4   ;;  %s4066_s22 = smov %s2393_s23 }
 0x2f6   : > { %s4067_s23 = smov %s2497_s10  ;;  %s4068_s24 = smov %s2401_s25 }
 0x2f7   : > { %s4069_s25 = smov %s4071_s29  ;;  %19 = sbr.rel (!%p17_p13) target bundleno = 5 (0x5), region = 105 }
 0x2fc   :  { %1926 = vsyncpa [#allocation5], 1 }
 0x2fd   :  { %1928 = vsyncpa [#allocation5 + $0x1], 1 }
 0x2fe   :  { %1929 = vsyncpa [#allocation6], 1 }
 0x2ff   :  { %1931 = vsyncpa [#allocation6 + $0x1], 1 }

</bundles_post_ra>
